<compile_context>
chip_gen: v7x
topology: tpu7x:2x2x1
jax: 0.10.0
libtpu: 0.0.40
codegen_flags: <defaults>
</compile_context>

<pallas_src>
import functools

import jax
import jax.numpy as jnp
from jax import lax
from jax.experimental import pallas as pl
from jax.experimental.pallas import tpu as pltpu


# ---------------------------------------------------------------------------
# Kernels
# ---------------------------------------------------------------------------

def mona_kernel(x_ref, phat_ref, w_ref, b_ref, o_ref, *, mxu_dtype):
    """out = x + mask(x) * (x @ W_comb) + b with mask = clip(cos(x, prompt),0,1).

    The per-row mask is a scalar, so the matmul is issued first (no serial
    dependence on the reductions) and the x*mask intermediate is never built.
    """
    x = x_ref[...]
    lhs = x if x.dtype == mxu_dtype else x.astype(mxu_dtype)
    z = jnp.dot(lhs, w_ref[...], preferred_element_type=jnp.float32)   # MXU

    xf = x if x.dtype == jnp.float32 else x.astype(jnp.float32)
    ssq = jnp.sum(xf * xf, axis=-1, keepdims=True)                     # [tm, 1]
    dotp = jnp.sum(xf * phat_ref[...], axis=-1, keepdims=True)         # [tm, 1]
    inv_norm = lax.rsqrt(jnp.maximum(ssq, 1e-24))                      # 1/max(||x||,1e-12)
    mask = jnp.clip(dotp * inv_norm, 0.0, 1.0)                         # [tm, 1]

    o_ref[...] = (xf + mask * z + b_ref[...]).astype(o_ref.dtype)


def mona_kernel_ntiled(x_ref, phat_ref, w_ref, b_ref, o_ref, mask_sc, *,
                       mxu_dtype, tn):
    """Output-channel-tiled variant for large Cp (e.g. v7x's 64 MiB VMEM).

    Grid = (row tiles, Cp // tn).  The x block is indexed only by the row tile
    so it stays resident across j; the per-row mask is computed once per row
    tile (j == 0) into VMEM scratch and reused for every column tile.
    """
    j = pl.program_id(1)

    @pl.when(j == 0)
    def _():
        xf = x_ref[...].astype(jnp.float32)
        ssq = jnp.sum(xf * xf, axis=-1, keepdims=True)
        dotp = jnp.sum(xf * phat_ref[...], axis=-1, keepdims=True)
        mask_sc[...] = jnp.clip(dotp * lax.rsqrt(jnp.maximum(ssq, 1e-24)),
                                0.0, 1.0)

    x = x_ref[...]
    lhs = x if x.dtype == mxu_dtype else x.astype(mxu_dtype)
    z = jnp.dot(lhs, w_ref[...], preferred_element_type=jnp.float32)   # [tm, tn]

    off = pl.multiple_of(j * tn, tn)                                   # tn % 128 == 0
    x_slice = x_ref[:, pl.ds(off, tn)].astype(jnp.float32)
    o_ref[...] = (x_slice + mask_sc[...] * z + b_ref[...]).astype(o_ref.dtype)


# ---------------------------------------------------------------------------
# VMEM budgeting helpers (generation-aware)
# ---------------------------------------------------------------------------

def _vmem_capacity_bytes():
    """Per-core physical VMEM; conservative (v7x-sized) fallback."""
    try:
        info = pltpu.get_tpu_info()
        cap = getattr(info, "vmem_capacity_bytes", None)
        if cap:
            return int(cap)
    except Exception:
        pass
    return 64 * 1024 * 1024


def _largest_row_tile(M, per_row_bytes, budget_bytes):
    for cand in (2048, 1024, 512, 256, 128):
        if cand <= M and cand * per_row_bytes <= budget_bytes:
            return cand
    return M if M < 128 else 128


# ---------------------------------------------------------------------------
# Wrapper
# ---------------------------------------------------------------------------

def mona_op(x, prompt, top_down_transform, proj_w, proj_b, *,
            tm=None, use_bf16_matmul=None, vmem_limit_bytes=None):
    """x: [B, H, W, C] (channels-last, as the PyTorch module's forward takes).

    With use_bf16_matmul (auto True for Cp >= 512) the MXU operands are bf16
    with f32 accumulation; mask math and the residual stay f32.  Expect ~1e-2
    relative error in that mode vs. a full-f32 reference.
    """
    B, H, W, C = x.shape
    M = B * H * W
    orig_dtype = x.dtype
    io_isz = jnp.dtype(orig_dtype).itemsize

    # -------- fold parameters (plain JAX, once) --------
    WpT = proj_w.reshape(C, C).T.astype(jnp.float32)          # 1x1 conv == x @ W.T
    W_comb = top_down_transform.astype(jnp.float32) @ WpT     # (x@T)@W.T == x@(T@W.T)
    p = prompt.astype(jnp.float32)
    p_hat = p / jnp.maximum(jnp.sqrt(jnp.sum(p * p)), 1e-12)
    bias = proj_b.astype(jnp.float32)

    # -------- small-C escape hatch --------
    # Padding e.g. C=4 to 128 lanes would inflate MXU work ~(128/C)^2 and HBM
    # traffic ~128/C; a tiny channel contraction is better left to XLA.
    if C <= 32:
        xf = x.reshape(M, C).astype(jnp.float32)
        ssq = jnp.sum(xf * xf, axis=-1, keepdims=True)
        dotp = xf @ p_hat.reshape(C, 1)
        mask = jnp.clip(dotp * lax.rsqrt(jnp.maximum(ssq, 1e-24)), 0.0, 1.0)
        out = xf + mask * (xf @ W_comb) + bias
        return out.reshape(B, H, W, C).astype(orig_dtype)

    # -------- lane-dense channel dim --------
    Cp = ((C + 127) // 128) * 128
    pad_c = Cp - C

    use_bf16 = (Cp >= 512) if use_bf16_matmul is None else bool(use_bf16_matmul)
    mxu_dtype = jnp.bfloat16 if use_bf16 else jnp.float32
    w_isz = jnp.dtype(mxu_dtype).itemsize

    if pad_c:
        # Channel zero-pad is required when C % 128 != 0: garbage lanes would
        # corrupt the per-row ssq/dotp reductions.  Garbage *rows* are fine.
        W_comb = jnp.pad(W_comb, ((0, pad_c), (0, pad_c)))
        p_hat = jnp.pad(p_hat, (0, pad_c))
        bias = jnp.pad(bias, (0, pad_c))
    W_mxu = W_comb.astype(mxu_dtype)
    p_hat = p_hat.reshape(1, Cp)
    bias = bias.reshape(1, Cp)

    # No row padding: the last (possibly ragged) row tile is handled by Pallas.
    x_flat = x.reshape(M, C)
    if pad_c:
        x_flat = jnp.pad(x_flat, ((0, 0), (0, pad_c)))

    # -------- generation-aware VMEM budgets --------
    vmem_cap = _vmem_capacity_bytes()                 # 128 MiB v5e/v6e, 64 MiB v7x
    if vmem_limit_bytes is None:
        vmem_limit_bytes = (3 * vmem_cap) // 4        # ~96 MiB v5e/v6e, ~48 MiB v7x

    # Constants are double-buffered by the pipeline (block index never changes,
    # so no re-DMA, just one extra VMEM copy each).
    const_bytes_1d = 2 * Cp * Cp * w_isz + 2 * 2 * Cp * 4 * 2
    # Per-row bytes: 2 in + 2 out pipeline buffers (io dtype) + ~2 f32 tile
    # equivalents of in-kernel intermediates (z / f32 view of x) + an extra
    # lhs-cast tile when the MXU dtype differs from the io dtype.
    per_row_1d = 4 * Cp * io_isz + 2 * Cp * 4
    if jnp.dtype(orig_dtype) != jnp.dtype(mxu_dtype):
        per_row_1d += Cp * w_isz

    if tm is None:
        tm_1d = _largest_row_tile(M, per_row_1d, max(vmem_limit_bytes - const_bytes_1d, 0))
    else:
        tm_1d = tm
    # Large Cp where the full weight + big row tiles don't coexist in VMEM:
    # tile output channels instead of collapsing the row tile.
    use_ntile = (tm is None and Cp >= 1024 and M >= 512 and tm_1d < 512)

    cost = pl.CostEstimate(
        flops=2 * M * Cp * Cp + 8 * M * Cp,
        transcendentals=M,
        bytes_accessed=2 * M * Cp * io_isz + Cp * Cp * w_isz + 3 * Cp * 4,
    )
    cparams = pltpu.CompilerParams(
        dimension_semantics=("parallel", "arbitrary") if use_ntile else ("parallel",),
        vmem_limit_bytes=int(vmem_limit_bytes),
    )

    if not use_ntile:
        tm_eff = tm_1d
        grid_spec = pl.GridSpec(
            grid=(pl.cdiv(M, tm_eff),),
            in_specs=[
                pl.BlockSpec((tm_eff, Cp), lambda i: (i, 0)),   # x tokens
                pl.BlockSpec((1, Cp), lambda i: (0, 0)),        # p_hat
                pl.BlockSpec((Cp, Cp), lambda i: (0, 0)),       # W_comb
                pl.BlockSpec((1, Cp), lambda i: (0, 0)),        # bias
            ],
            out_specs=pl.BlockSpec((tm_eff, Cp), lambda i: (i, 0)),
        )
        out = pl.pallas_call(
            functools.partial(mona_kernel, mxu_dtype=mxu_dtype),
            out_shape=jax.ShapeDtypeStruct((M, Cp), orig_dtype),
            grid_spec=grid_spec,
            compiler_params=cparams,
            cost_estimate=cost,
        )(x_flat, p_hat, W_mxu, bias)
    else:
        tn = next(t for t in (768, 640, 512, 384, 256, 128) if Cp % t == 0)
        const_bytes_2d = 2 * Cp * tn * w_isz + 2 * 2 * Cp * 4 + 2 * 2 * tn * 4
        per_row_2d = 2 * Cp * io_isz + 2 * tn * io_isz + Cp * 4 + tn * 4 + 4
        if jnp.dtype(orig_dtype) != jnp.dtype(mxu_dtype):
            per_row_2d += Cp * w_isz
        tm_eff = _largest_row_tile(M, per_row_2d,
                                   max(vmem_limit_bytes - const_bytes_2d, 0))
        grid_spec = pltpu.PrefetchScalarGridSpec(
            num_scalar_prefetch=0,
            grid=(pl.cdiv(M, tm_eff), Cp // tn),
            in_specs=[
                pl.BlockSpec((tm_eff, Cp), lambda i, j: (i, 0)),  # x resident across j
                pl.BlockSpec((1, Cp), lambda i, j: (0, 0)),       # p_hat
                pl.BlockSpec((Cp, tn), lambda i, j: (0, j)),      # W column tile
                pl.BlockSpec((1, tn), lambda i, j: (0, j)),       # bias tile
            ],
            out_specs=pl.BlockSpec((tm_eff, tn), lambda i, j: (i, j)),
            scratch_shapes=[pltpu.VMEM((tm_eff, 1), jnp.float32)],
        )
        out = pl.pallas_call(
            functools.partial(mona_kernel_ntiled, mxu_dtype=mxu_dtype, tn=tn),
            out_shape=jax.ShapeDtypeStruct((M, Cp), orig_dtype),
            grid_spec=grid_spec,
            compiler_params=cparams,
            cost_estimate=cost,
        )(x_flat, p_hat, W_mxu, bias)

    if pad_c:
        out = out[:, :C]
    return out.reshape(B, H, W, C)


# ---------------------------------------------------------------------------
# Plain-JAX reference mirroring the PyTorch forward
# ---------------------------------------------------------------------------

def mona_ref(x, prompt, top_down_transform, proj_w, proj_b):
    B, H, W, C = x.shape
    N = H * W
    identity = x
    xf = x.reshape(B, N, C)
    x_hat = xf / jnp.maximum(
        jnp.sqrt(jnp.sum(xf * xf, axis=-1, keepdims=True)), 1e-12)
    p_hat = prompt / jnp.maximum(jnp.sqrt(jnp.sum(prompt * prompt)), 1e-12)
    cos_sim = x_hat @ p_hat[None, :, None]                      # [B, N, 1]
    mask = jnp.clip(cos_sim, 0.0, 1.0)
    xf = xf * mask
    xf = xf @ top_down_transform
    xf = xf.reshape(B, H, W, C)
    xf = xf @ proj_w.reshape(C, C).T + proj_b                   # 1x1 conv, channels-last
    return identity + xf


if __name__ == "__main__":
    # Keep plain-XLA matmuls (reference + wrapper-side weight folding) in full
    # f32 so the ~1e-5-level comparison against the kernel is meaningful.
    jax.config.update("jax_default_matmul_precision", "highest")

    def make_case(case_key, B, H, W, C):
        kx, kp, kw, kb = jax.random.split(case_key, 4)
        x = jax.random.normal(kx, (B, H, W, C), dtype=jnp.float32)
        prompt = jax.random.normal(kp, (C,), dtype=jnp.float32)      # torch.randn(C)
        tdt = jnp.eye(C, dtype=jnp.float32)                          # torch.eye(C)
        bound = 1.0 / float(C) ** 0.5                                # Conv2d default-ish
        proj_w = jax.random.uniform(kw, (C, C, 1, 1), jnp.float32, -bound, bound)
        proj_b = jax.random.uniform(kb, (C,), jnp.float32, -bound, bound)
        return x, prompt, tdt, proj_w, proj_b

    cases = [
        (2, 8, 8, 128),    # lane-dense MXU path, no pad/slice, Pallas kernel
        (2, 8, 9, 96),     # channel pad to Cp=128 + ragged last row tile
        (2, 16, 16, 4),    # small-C escape hatch (no pad-to-128 blowup)
    ]
    keys = jax.random.split(jax.random.PRNGKey(0), len(cases))
    for case_key, (B, H, W, C) in zip(keys, cases):
        args = make_case(case_key, B, H, W, C)
        out = jax.block_until_ready(mona_op(*args))
        ref = mona_ref(*args)
        assert out.shape == (B, H, W, C)
        err = float(jnp.max(jnp.abs(out - ref)))
        assert jnp.allclose(out, ref, atol=2e-5, rtol=2e-5), (
            f"mismatch at shape {(B, H, W, C)}: max abs err {err}")

    print("KERNEL_OK")
</pallas_src>

<mosaic_0001>
module attributes {stable_mosaic.version = 11 : i64} {
  func.func @mona_kernel(%arg0: i32, %arg1: memref<128x128xf32, #tpu.memory_space<vmem>>, %arg2: memref<1x128xf32, #tpu.memory_space<vmem>>, %arg3: memref<128x128xf32, #tpu.memory_space<vmem>>, %arg4: memref<1x128xf32, #tpu.memory_space<vmem>>, %arg5: memref<128x128xf32, #tpu.memory_space<vmem>>) attributes {dimension_semantics = [#tpu.dimension_semantics<parallel>], iteration_bounds = array<i64: 1>, scalar_prefetch = 0 : i64, scratch_operands = 0 : i64, tpu.core_type = #tpu.core_type<tc>, window_params = [{transform_indices = @transform_0, window_bounds = array<i64: 128, 128>}, {pipeline_mode = #tpu.pipeline_mode<synchronous>, transform_indices = @transform_1, window_bounds = array<i64: 1, 128>}, {pipeline_mode = #tpu.pipeline_mode<synchronous>, transform_indices = @transform_2, window_bounds = array<i64: 128, 128>}, {pipeline_mode = #tpu.pipeline_mode<synchronous>, transform_indices = @transform_3, window_bounds = array<i64: 1, 128>}, {transform_indices = @transform_4, window_bounds = array<i64: 128, 128>}]} {
    %c0 = arith.constant 0 : index
    %c0_0 = arith.constant 0 : index
    %0 = vector.load %arg1[%c0, %c0_0] : memref<128x128xf32, #tpu.memory_space<vmem>>, vector<128x128xf32>
    %c0_1 = arith.constant 0 : index
    %c0_2 = arith.constant 0 : index
    %1 = vector.load %arg3[%c0_1, %c0_2] : memref<128x128xf32, #tpu.memory_space<vmem>>, vector<128x128xf32>
    %cst = arith.constant dense<0.000000e+00> : vector<128x128xf32>
    %2 = tpu.matmul %0, %1, %cst {dimension_numbers = #tpu.dot_dimension_numbers<[1], [0], [0], [1], [0, 0, 1, 1], [], []>, precision = #tpu.contract_precision<fp32>} : vector<128x128xf32>, vector<128x128xf32>, vector<128x128xf32> -> vector<128x128xf32>
    %3 = arith.mulf %0, %0 : vector<128x128xf32>
    %cst_3 = arith.constant dense<0.000000e+00> : vector<128xf32>
    %4 = vector.multi_reduction <add>, %3, %cst_3 [1] : vector<128x128xf32> to vector<128xf32>
    %5 = vector.shape_cast %4 : vector<128xf32> to vector<128x1xf32>
    %c0_4 = arith.constant 0 : index
    %c0_5 = arith.constant 0 : index
    %6 = vector.load %arg2[%c0_4, %c0_5] : memref<1x128xf32, #tpu.memory_space<vmem>>, vector<1x128xf32>
    %7 = vector.broadcast %6 : vector<1x128xf32> to vector<128x128xf32>
    %8 = arith.mulf %0, %7 : vector<128x128xf32>
    %cst_6 = arith.constant dense<0.000000e+00> : vector<128xf32>
    %9 = vector.multi_reduction <add>, %8, %cst_6 [1] : vector<128x128xf32> to vector<128xf32>
    %10 = vector.shape_cast %9 : vector<128xf32> to vector<128x1xf32>
    %cst_7 = arith.constant 1.000000e-24 : f32
    %11 = vector.broadcast %cst_7 : f32 to vector<128x1xf32>
    %12 = arith.maximumf %5, %11 : vector<128x1xf32>
    %13 = math.rsqrt %12 : vector<128x1xf32>
    %14 = arith.mulf %10, %13 : vector<128x1xf32>
    %cst_8 = arith.constant 0.000000e+00 : f32
    %cst_9 = arith.constant 1.000000e+00 : f32
    %15 = vector.broadcast %cst_8 : f32 to vector<128x1xf32>
    %16 = arith.maximumf %15, %14 : vector<128x1xf32>
    %17 = vector.broadcast %cst_9 : f32 to vector<128x1xf32>
    %18 = arith.minimumf %17, %16 : vector<128x1xf32>
    %19 = vector.broadcast %18 : vector<128x1xf32> to vector<128x128xf32>
    %20 = arith.mulf %19, %2 : vector<128x128xf32>
    %21 = arith.addf %0, %20 : vector<128x128xf32>
    %c0_10 = arith.constant 0 : index
    %c0_11 = arith.constant 0 : index
    %22 = vector.load %arg4[%c0_10, %c0_11] : memref<1x128xf32, #tpu.memory_space<vmem>>, vector<1x128xf32>
    %23 = vector.broadcast %22 : vector<1x128xf32> to vector<128x128xf32>
    %24 = arith.addf %21, %23 : vector<128x128xf32>
    %c0_12 = arith.constant 0 : index
    %c0_13 = arith.constant 0 : index
    %25 = vector.load %arg5[%c0_12, %c0_13] : memref<128x128xf32, #tpu.memory_space<vmem>>, vector<128x128xf32>
    tpu.vector_store %arg5[%c0_12, %c0_13], %24 {strides = array<i32>} : memref<128x128xf32, #tpu.memory_space<vmem>>, vector<128x128xf32>,
    return
  }
  func.func @transform_0(%arg0: i32) -> (i32, i32) {
    %c0_i32 = arith.constant 0 : i32
    %c0_i32_0 = arith.constant 0 : i32
    return %arg0, %c0_i32 : i32, i32
  }
  func.func @transform_1(%arg0: i32) -> (i32, i32) {
    %c0_i32 = arith.constant 0 : i32
    %c0_i32_0 = arith.constant 0 : i32
    %c0_i32_1 = arith.constant 0 : i32
    return %c0_i32, %c0_i32_0 : i32, i32
  }
  func.func @transform_2(%arg0: i32) -> (i32, i32) {
    %c0_i32 = arith.constant 0 : i32
    %c0_i32_0 = arith.constant 0 : i32
    %c0_i32_1 = arith.constant 0 : i32
    return %c0_i32, %c0_i32_0 : i32, i32
  }
  func.func @transform_3(%arg0: i32) -> (i32, i32) {
    %c0_i32 = arith.constant 0 : i32
    %c0_i32_0 = arith.constant 0 : i32
    %c0_i32_1 = arith.constant 0 : i32
    return %c0_i32, %c0_i32_0 : i32, i32
  }
  func.func @transform_4(%arg0: i32) -> (i32, i32) {
    %c0_i32 = arith.constant 0 : i32
    %c0_i32_0 = arith.constant 0 : i32
    return %arg0, %c0_i32 : i32, i32
  }
}

</mosaic_0001>

<bundles_post_ra>
// kernel: tpu_custom_call.1
= control target key start
LH: loop header
LB: loop body
LE: loop exit
PB: predicated region body
PF: predicated region fallthrough
CT: control target
= control target key end

     0   :  { %9 = vsyncpa [#allocation3], 0  ;;  %s3295_s0 = inlined_call_operand.hbm [shape: f32[128,128], index: 0, kind: input, shape index: {}]   ;;  %s3296_s1 = inlined_call_operand.vmem [shape: f32[1,128], index: 1, kind: input, shape index: {}]   ;;  %s3297_s2 = inlined_call_operand.hbm [shape: f32[128,128], index: 2, kind: input, shape index: {}]   ;;  %s3298_s3 = inlined_call_operand.vmem [shape: f32[1,128], index: 3, kind: input, shape index: {}]   ;;  %s3299_s4 = inlined_call_operand.hbm [shape: f32[128,128], index: 4, kind: output, shape index: {}]  }
   0x1   :  { %10 = vsyncpa [#allocation6], 0 }
   0x2   :  { %11 = vsyncpa [#allocation4], 0  ;;  %s2562_s15 = smov [#allocation2]   ;;  %s2490_s19 = scalar_lea.hbm %s3295_s0, 2048 }
   0x3   :  { %s17_s16 = sshll.u32 %s2562_s15, 4  ;;  %p2491_p0 = scmp.ne.s32.totalorder %s3295_s0, %s2490_s19  ;;  %s18_s16 = int_to_ptr.vmem [resolvable:$true] %s17_s16 }
   0x4   :  { %p2494_p1 = scmp.lt.u32.totalorder %s2490_s19, %s3295_s0 }
   0x6   :  { %p2496_p2 = pnand %p2494_p1, %p2491_p0 }
   0x8   :  { %2499 = shalt.err (!%p2496_p2)
}
   0x9   :  { %s2500_s24 = scalar_lea.vmem %s18_s16, 2048  ;;  %p2505_p4 = scmp.lt.s32.totalorder %s18_s16, %s18_s16 }
   0xa   :  { %p2501_p3 = scmp.ne.s32.totalorder %s18_s16, %s2500_s24  ;;  %p2506_p5 = scmp.lt.s32.totalorder %s2500_s24, %s2500_s24 }
   0xc   :  { %p2507_p6 = por %p2506_p5, %p2505_p4 }
   0xe   :  { %p2508_p7 = pnand %p2507_p6, %p2501_p3 }
  0x10   :  { %2511 = shalt.err (!%p2508_p7)
}
  0x11   :  { %s2563_s25 = smov 128   ;;  %s2564_s26 = smov 8  }
  0x12   :  { %23 = dma.hbm_to_vmem [thread:$0]  %s3295_s0, 2048, %s18_s16, [#allocation3], %s2563_s25, %s2563_s25, %s2564_s26  }
  0x13   :  { %s2565_s29 = smov [#allocation5]   ;;  %s2512_s7 = scalar_lea.hbm %s3297_s2, 2048 }
  0x14   :  { %s31_s30 = sshll.u32 %s2565_s29, 4  ;;  %p2513_p8 = scmp.ne.s32.totalorder %s3297_s2, %s2512_s7  ;;  %s32_s30 = int_to_ptr.vmem [resolvable:$true] %s31_s30 }
  0x15   :  { %p2516_p9 = scmp.lt.u32.totalorder %s2512_s7, %s3297_s2 }
  0x17   :  { %p2518_p10 = pnand %p2516_p9, %p2513_p8 }
  0x19   :  { %2521 = shalt.err (!%p2518_p10)
}
  0x1a   :  { %s2522_s12 = scalar_lea.vmem %s32_s30, 2048  ;;  %p2527_p12 = scmp.lt.s32.totalorder %s32_s30, %s32_s30 }
  0x1b   :  { %p2523_p11 = scmp.ne.s32.totalorder %s32_s30, %s2522_s12  ;;  %p2528_p13 = scmp.lt.s32.totalorder %s2522_s12, %s2522_s12 }
  0x1d   :  { %p2529_p0 = por %p2528_p13, %p2527_p12 }
  0x1f   :  { %p2530_p1 = pnand %p2529_p0, %p2523_p11 }
  0x21   :  { %2533 = shalt.err (!%p2530_p1)
}
  0x22   :  { %37 = dma.hbm_to_vmem [thread:$0]  %s3297_s2, 2048, %s32_s30, [#allocation6], %s2563_s25, %s2563_s25, %s2564_s26  }
  0x23   :  { %2556 = dma.done.wait [#allocation3], 2048  }
  0x24   :  { %2557 = vsyncadd [#allocation3], 4294965248 }
  0x25   :  { %2558 = dma.done.wait [#allocation6], 2048  }
  0x26   :  { %2559 = vsyncadd [#allocation6], 4294965248  ;;  %v62_v0 = vld [vmem:[#allocation5] sm:$0xff]  ;;  %v63_v1 = vld [vmem:[#allocation5 + $0x8] sm:$0xff] }
  0x27   :  { %v64_v2 = vld [vmem:[#allocation5 + $0x10] sm:$0xff]  ;;  %v79_v3 = vand.u32 4294901760, %v62_v0  ;;  %v82_v4 = vand.u32 4294901760, %v63_v1  ;;  %v65_v5 = vld [vmem:[#allocation5 + $0x18] sm:$0xff]  ;;  %v2622_v7 = vld [vmem:[#allocation5 + $0x20] sm:$0xff] }
  0x28   :  { %v85_v6 = vand.u32 4294901760, %v64_v2  ;;  %v2624_v8 = vld [vmem:[#allocation5 + $0x28] sm:$0xff]  ;;  %v88_v9 = vand.u32 4294901760, %v65_v5  ;;  %v91_v11 = vand.u32 4294901760, %v2622_v7  ;;  %v2632_v14 = vld [vmem:[#allocation5 + $0x30] sm:$0xff]  ;;  %v2634_v15 = vld [vmem:[#allocation5 + $0x38] sm:$0xff] }
  0x29   :  { %v2626_v10 = vpack.c.bf16 %v82_v4, %v79_v3  ;;  %v94_v12 = vand.u32 4294901760, %v2624_v8  ;;  %v2638_v16 = vld [vmem:[#allocation2] sm:$0xff]  ;;  %v97_v19 = vand.u32 4294901760, %v2632_v14  ;;  %v3309_v20 = vand.u32 4294901760, %v2634_v15  ;;  %v2655_v21 = vld [vmem:[#allocation2 + $0x8] sm:$0xff]  ;;  %v2681_v30 = vld [vmem:[#allocation5 + $0x50] sm:$0xff] }
  0x2a   :  { %v2630_v13 = vpack.c.bf16 %v88_v9, %v85_v6  ;;  %3374 = vst [vmem:[#allocation11_spill] sm:$0xff] %v2638_v16  ;;  %v2643_v17 = vand.u32 4294901760, %v2638_v16  ;;  %3375 = vst [vmem:[#allocation12_spill] sm:$0xff] %v2655_v21  ;;  %v2657_v22 = vld [vmem:[#allocation5 + $0x40] sm:$0xff]  ;;  %v2659_v23 = vld [vmem:[#allocation5 + $0x48] sm:$0xff]  ;;  %v2669_v26 = vand.u32 4294901760, %v2655_v21  ;;  %v2690_v35 = vsub.f32 %v62_v0, %v79_v3 }
  0x2b   :  { %2167 = vmatprep.subr.bf16.mxu1 %v2626_v10  ;;  %2263 = vmatprep.subr.bf16.mxu0 %v2626_v10  ;;  %v2651_v18 = vpack.c.bf16 %v94_v12, %v91_v11  ;;  %v2677_v27 = vpack.c.bf16 %v3309_v20, %v97_v19  ;;  %v3308_v28 = vand.u32 4294901760, %v2657_v22  ;;  %v3307_v29 = vand.u32 4294901760, %v2659_v23  ;;  %v2683_v31 = vld [vmem:[#allocation2 + $0x10] sm:$0xff]  ;;  %v2685_v32 = vld [vmem:[#allocation5 + $0x58] sm:$0xff]  ;;  %v2697_v38 = vld [vmem:[#allocation5 + $0x60] sm:$0xff] }
  0x2c   :  { %2169 = vmatpush3.bf16.msra.mxu1 %v2626_v10  ;;  %2265 = vmatpush3.bf16.msra.mxu0 %v2626_v10  ;;  %v2663_v24 = vsub.f32 %v2638_v16, %v2643_v17  ;;  %3378 = vst [vmem:[#allocation15_spill] sm:$0xff] %v2683_v31  ;;  %v2688_v34 = vld [vmem:[#allocation2 + $0x18] sm:$0xff]  ;;  %v2692_v36 = vsub.f32 %v63_v1, %v82_v4  ;;  %v3306_v37 = vand.u32 4294901760, %v2681_v30  ;;  %v2699_v39 = vld [vmem:[#allocation5 + $0x68] sm:$0xff]  ;;  %v2706_v42 = vand.u32 4294901760, %v2683_v31  ;;  %v2717_v45 = vld [vmem:[#allocation5 + $0x70] sm:$0xff] }
  0x2d   :  { %2171 = vmatprep.subr.bf16.mxu1 %v2630_v13  ;;  %2267 = vmatprep.subr.bf16.mxu0 %v2630_v13  ;;  %3377 = vst [vmem:[#allocation14_spill] sm:$0xff] %v2677_v27  ;;  %3379 = vst [vmem:[#allocation16_spill] sm:$0xff] %v2688_v34  ;;  %v2703_v41 = vsub.f32 %v2655_v21, %v2669_v26  ;;  %v2714_v43 = vpack.c.bf16 %v3307_v29, %v3308_v28  ;;  %v3305_v44 = vand.u32 4294901760, %v2685_v32  ;;  %v2719_v46 = vld [vmem:[#allocation5 + $0x78] sm:$0xff]  ;;  %v2728_v50 = vld [vmem:[#allocation2 + $0x20] sm:$0xff] }
  0x2e   :  { %3376 = vst [vmem:[#allocation13_spill] sm:$0xff] %v2663_v24  ;;  %v161_v25 = vand.u32 4294901760, %v2663_v24  ;;  %v2722_v47 = vand.u32 4294901760, %v2688_v34  ;;  %v2724_v48 = vsub.f32 %v64_v2, %v85_v6  ;;  %v2726_v49 = vsub.f32 %v65_v5, %v88_v9  ;;  %3382 = vst [vmem:[#allocation19_spill] sm:$0xff] %v2728_v50  ;;  %v2734_v55 = vld [vmem:[#allocation2 + $0x28] sm:$0xff]  ;;  %v2765_v2 = vld [vmem:[#allocation2 + $0x30] sm:$0xff] }
  0x2f   :  { %3380 = vst [vmem:[#allocation17_spill] sm:$0xff] %v2703_v41  ;;  %3381 = vst [vmem:[#allocation18_spill] sm:$0xff] %v2714_v43  ;;  %v3303_v51 = vand.u32 4294901760, %v2697_v38  ;;  %v3302_v52 = vand.u32 4294901760, %v2699_v39  ;;  %v322_v53 = vand.u32 4294901760, %v2690_v35  ;;  %v329_v54 = vand.u32 4294901760, %v2692_v36 }
  0x30   :  { %2173 = vmatpush3.bf16.msra.mxu1 %v2630_v13  ;;  %2269 = vmatpush3.bf16.msra.mxu0 %v2630_v13  ;;  %v162_v33 = vsub.f32 %v2663_v24, %v161_v25  ;;  %3383 = vst [vmem:[#allocation20_spill] sm:$0xff] %v2734_v55  ;;  %v3301_v56 = vand.u32 4294901760, %v2717_v45  ;;  %v3300_v57 = vand.u32 4294901760, %v2719_v46  ;;  %v3304_v58 = vand.u32 4294901760, %v2703_v41  ;;  %3387 = vst [vmem:[#allocation24_spill] sm:$0xff] %v2765_v2  ;;  %v2779_v9 = vld [vmem:[#allocation2 + $0x38] sm:$0xff] }
  0x31   :  { %2175 = vmatprep.subr.bf16.mxu1 %v2651_v18  ;;  %2271 = vmatprep.subr.bf16.mxu0 %v2651_v18  ;;  %v2743_v59 = vsub.f32 %v2683_v31, %v2706_v42  ;;  %v2751_v60 = vpack.c.bf16 %v3305_v44, %v3306_v37  ;;  %v2755_v61 = vsub.f32 %v2688_v34, %v2722_v47  ;;  %v336_v62 = vand.u32 4294901760, %v2724_v48 }
  0x32   :  { %2030 = vmatprep.mubr.f32.mxu0 %v161_v25  ;;  %v163_v40 = vand.u32 4294901760, %v162_v33  ;;  %v2759_v63 = vand.u32 4294901760, %v2728_v50  ;;  %v343_v0 = vand.u32 4294901760, %v2726_v49  ;;  %v2763_v1 = vand.u32 4294901760, %v2734_v55  ;;  %3388 = vst [vmem:[#allocation25_spill] sm:$0xff] %v2779_v9 }
  0x33   :  { %3384 = vst [vmem:[#allocation21_spill] sm:$0xff] %v2743_v59  ;;  %3385 = vst [vmem:[#allocation22_spill] sm:$0xff] %v2751_v60  ;;  %v323_v3 = vsub.f32 %v2690_v35, %v322_v53  ;;  %v330_v4 = vsub.f32 %v2692_v36, %v329_v54  ;;  %v2772_v5 = vsub.f32 %v2622_v7, %v91_v11  ;;  %v3312_v11 = vand.u32 4294901760, %v2743_v59 }
  0x34   :  { %2177 = vmatpush3.bf16.msra.mxu1 %v2651_v18  ;;  %2273 = vmatpush3.bf16.msra.mxu0 %v2651_v18  ;;  %3386 = vst [vmem:[#allocation23_spill] sm:$0xff] %v2755_v61  ;;  %v2777_v6 = vsub.f32 %v2624_v8, %v94_v12  ;;  %v2787_v25 = vpack.c.bf16 %v3302_v52, %v3303_v51  ;;  %v2818_v51 = vand.u32 4294901760, %v2779_v9  ;;  %v3402_v34 = vand.u32 4294901760, %v2657_v22 }
  0x35   :  { %2179 = vmatprep.subr.bf16.mxu1 %v2677_v27  ;;  %2275 = vmatprep.subr.bf16.mxu0 %v2677_v27  ;;  %v2793_v7 = vpack.c.bf16 %v3300_v57, %v3301_v56  ;;  %v2798_v8 = vsub.f32 %v2703_v41, %v3304_v58  ;;  %v337_v33 = vsub.f32 %v2724_v48, %v336_v62  ;;  %v2810_v57 = vand.u32 4294901760, %v2765_v2 }
  0x36   :  { %1862 = vmatprep.mubr.f32.mxu1 %v163_v40  ;;  %3389 = vst [vmem:[#allocation26_spill] sm:$0xff] %v2787_v25  ;;  %v2807_v40 = vsub.f32 %v2728_v50, %v2759_v63  ;;  %v344_v56 = vsub.f32 %v2726_v49, %v343_v0  ;;  %v2815_v52 = vsub.f32 %v2734_v55, %v2763_v1  ;;  %3394 = vst [vmem:[#allocation31_spill] sm:$0xff] %v2818_v51 }
  0x37   :  { %3390 = vst [vmem:[#allocation27_spill] sm:$0xff] %v2793_v7  ;;  %3392 = vst [vmem:[#allocation29_spill] sm:$0xff] %v2810_v57  ;;  %v2823_v58 = vsub.f32 %v2632_v14, %v97_v19  ;;  %v324_v44 = vand.u32 4294901760, %v323_v3  ;;  %v331_v37 = vand.u32 4294901760, %v330_v4  ;;  %v350_v29 = vand.u32 4294901760, %v2772_v5  ;;  %v2842_v3 = vld [vmem:[#allocation2 + $0x40] sm:$0xff] }
  0x38   :  { %2181 = vmatpush3.bf16.msra.mxu1 %v2677_v27  ;;  %2277 = vmatpush3.bf16.msra.mxu0 %v2677_v27  ;;  %3391 = vst [vmem:[#allocation28_spill] sm:$0xff] %v2807_v40  ;;  %3393 = vst [vmem:[#allocation30_spill] sm:$0xff] %v2815_v52  ;;  %v357_v28 = vand.u32 4294901760, %v2777_v6  ;;  %v173_v12 = vand.u32 4294901760, %v2798_v8  ;;  %v2830_v20 = vpack.c.bf16 %v329_v54, %v322_v53  ;;  %v3395_v14 = vand.u32 4294901760, %v2634_v15 }
  0x39   :  { %2183 = vmatprep.subr.bf16.mxu1 %v2714_v43  ;;  %2279 = vmatprep.subr.bf16.mxu0 %v2714_v43  ;;  %v2835_v55 = vsub.f32 %v2743_v59, %v3312_v11  ;;  %3396 = vst [vmem:[#allocation32_spill] sm:$0xff] %v2842_v3  ;;  %v3397_v4 = vand.u32 4294901760, %v2755_v61  ;;  %v338_v54 = vand.u32 4294901760, %v337_v33  ;;  %v2854_v11 = vsub.f32 %v2765_v2, %v2810_v57 }
  0x3a   :  { %v2840_v19 = vsub.f32 %v2634_v15, %v3395_v14  ;;  %v345_v15 = vand.u32 4294901760, %v344_v56  ;;  %v2859_v50 = vsub.f32 %v2779_v9, %v2818_v51  ;;  %v2198_v21 = vpack.c.bf16 %v331_v37, %v324_v44  ;;  %v2871_v9 = vld [vmem:[#allocation2 + $0x48] sm:$0xff] }
  0x3b   :  { %v2849_v53 = vsub.f32 %v2755_v61, %v3397_v4  ;;  %3398 = vst [vmem:[#allocation33_spill] sm:$0xff] %v2854_v11  ;;  %v351_v4 = vsub.f32 %v2772_v5, %v350_v29  ;;  %v358_v33 = vsub.f32 %v2777_v6, %v357_v28  ;;  %v2865_v8 = vand.u32 4294901760, %v2842_v3  ;;  %3401 = vst [vmem:[#allocation36_spill] sm:$0xff] %v2871_v9 }
  0x3c   :  { %2185 = vmatpush3.bf16.msra.mxu1 %v2714_v43  ;;  %2281 = vmatpush3.bf16.msra.mxu0 %v2714_v43  ;;  %3399 = vst [vmem:[#allocation34_spill] sm:$0xff] %v2859_v50  ;;  %v183_v56 = vand.u32 4294901760, %v2835_v55  ;;  %v371_v14 = vand.u32 4294901760, %v2840_v19  ;;  %v2876_v37 = vsub.f32 %v2657_v22, %v3402_v34  ;;  %v3403_v44 = vand.u32 4294901760, %v2659_v23  ;;  %v2892_v34 = vld [vmem:[#allocation2 + $0x50] sm:$0xff] }
  0x3d   :  { %2187 = vmatprep.subr.bf16.mxu1 %v2751_v60  ;;  %2283 = vmatprep.subr.bf16.mxu0 %v2751_v60  ;;  %3400 = vst [vmem:[#allocation35_spill] sm:$0xff] %v2865_v8  ;;  %v193_v55 = vand.u32 4294901760, %v2849_v53  ;;  %v2298_v24 = vpack.c.bf16 %v343_v0, %v336_v62  ;;  %v3404_v31 = vand.u32 4294901760, %v2807_v40  ;;  %3405 = vst [vmem:[#allocation37_spill] sm:$0xff] %v2892_v34  ;;  %v3407_v53 = vand.u32 4294901760, %v2823_v58 }
  0x3e   :  { %v2881_v2 = vsub.f32 %v2659_v23, %v3403_v44  ;;  %v3406_v23 = vand.u32 4294901760, %v2815_v52  ;;  %v352_v0 = vand.u32 4294901760, %v351_v4  ;;  %v359_v43 = vand.u32 4294901760, %v358_v33  ;;  %v2918_v33 = vld [vmem:[#allocation2 + $0x58] sm:$0xff] }
  0x3f   :  { %v2889_v16 = vsub.f32 %v2807_v40, %v3404_v31  ;;  %v365_v62 = vsub.f32 %v2823_v58, %v3407_v53  ;;  %v2905_v31 = vsub.f32 %v2842_v3, %v2865_v8  ;;  %v2908_v22 = vand.u32 4294901760, %v2871_v9  ;;  %3408 = vst [vmem:[#allocation38_spill] sm:$0xff] %v2918_v33 }
  0x40   :  { %2189 = vmatpush3.bf16.msra.mxu1 %v2751_v60  ;;  %2285 = vmatpush3.bf16.msra.mxu0 %v2751_v60  ;;  %v2897_v44 = vsub.f32 %v2815_v52, %v3406_v23  ;;  %v2916_v4 = vand.u32 4294901760, %v2892_v34  ;;  %v2922_v60 = vpack.c.bf16 %v357_v28, %v350_v29  ;;  %v3409_v3 = vand.u32 4294901760, %v2854_v11 }
  0x41   :  { %2191 = vmatprep.subr.bf16.mxu1 %v2787_v25  ;;  %2287 = vmatprep.subr.bf16.mxu0 %v2787_v25  ;;  %v203_v53 = vand.u32 4294901760, %v2889_v16  ;;  %v3411_v51 = vand.u32 4294901760, %v2859_v50  ;;  %v366_v16 = vand.u32 4294901760, %v365_v62  ;;  %v3412_v28 = vand.u32 4294901760, %v2685_v32 }
  0x42   :  { %v213_v8 = vand.u32 4294901760, %v2897_v44  ;;  %v3414_v57 = vand.u32 4294901760, %v2703_v41  ;;  %v3415_v62 = vand.u32 4294901760, %v2876_v37  ;;  %v3419_v44 = vand.u32 4294901760, %v2697_v38 }
  0x43   :  { %v2938_v27 = vsub.f32 %v2859_v50, %v3411_v51  ;;  %v2943_v29 = vsub.f32 %v2685_v32, %v3412_v28  ;;  %v2955_v51 = vand.u32 4294901760, %v2918_v33  ;;  %v2968_v28 = vld [vmem:[#allocation2 + $0x68] sm:$0xff] }
  0x44   :  { %2193 = vmatpush3.bf16.msra.mxu1 %v2787_v25  ;;  %2289 = vmatpush3.bf16.msra.mxu0 %v2787_v25  ;;  %v2202_v25 = vpack.c.bf16 %v345_v15, %v338_v54  ;;  %v372_v54 = vsub.f32 %v2840_v19, %v371_v14  ;;  %v3410_v15 = vand.u32 4294901760, %v2681_v30  ;;  %3417 = vst [vmem:[#allocation40_spill] sm:$0xff] %v2968_v28 }
  0x45   :  { %2195 = vmatprep.subr.bf16.mxu1 %v2793_v7  ;;  %2291 = vmatprep.subr.bf16.mxu0 %v2793_v7 }
  0x46   :  { %v2932_v23 = vsub.f32 %v2681_v30, %v3410_v15  ;;  %v2206_v30 = vpack.c.bf16 %v359_v43, %v352_v0  ;;  %v2952_v15 = vsub.f32 %v2871_v9, %v2908_v22  ;;  %v373_v32 = vand.u32 4294901760, %v372_v54 }
  0x47   :  { %v2966_v0 = vsub.f32 %v2892_v34, %v2916_v4  ;;  %v233_v34 = vand.u32 4294901760, %v2938_v27 }
  0x48   :  { %2197 = vmatpush3.bf16.msra.mxu1 %v2793_v7  ;;  %2293 = vmatpush3.bf16.msra.mxu0 %v2793_v7  ;;  %v2927_v7 = vsub.f32 %v2854_v11, %v3409_v3  ;;  %v2945_v3 = vld [vmem:[#allocation2 + $0x60] sm:$0xff]  ;;  %v3429_v41 = vand.u32 4294901760, %v2932_v23 }
  0x49   :  { %2199 = vmatprep.subr.bf16.mxu1 %v2198_v21  ;;  %2295 = vmatprep.subr.bf16.mxu0 %v2830_v20  ;;  %3413 = vst [vmem:[#allocation39_spill] sm:$0xff] %v2945_v3 }
  0x4b   :  { %1863 = vmatmul.mubr.f32.vlgmr.msra.gmra.mrb[0].mxu1 %v173_v12  ;;  %2031 = vmatmul.mubr.f32.vlgmr.msra.gmra.mrb[0].mxu0 %v3414_v57  ;;  %v379_v12 = vsub.f32 %v2876_v37, %v3415_v62  ;;  %v3416_v57 = vand.u32 4294901760, %v2881_v2  ;;  %v2975_v62 = vand.u32 4294901760, %v2945_v3 }
  0x4c   :  { %2201 = vmatpush3.bf16.msra.mxu1 %v2198_v21  ;;  %2297 = vmatpush3.bf16.msra.mxu0 %v2830_v20  ;;  %v3418_v21 = vand.u32 4294901760, %v2743_v59  ;;  %v223_v20 = vand.u32 4294901760, %v2927_v7  ;;  %v3421_v7 = vand.u32 4294901760, %v2699_v39  ;;  %v2991_v59 = vld [vmem:[#allocation2 + $0x70] sm:$0xff] }
  0x4d   :  { %v386_v43 = vsub.f32 %v2881_v2, %v3416_v57  ;;  %1865 = vmatprep.mubr.f32.mxu1 %v183_v56  ;;  %v2980_v57 = vsub.f32 %v2697_v38, %v3419_v44  ;;  %2203 = vmatprep.subr.bf16.mxu1 %v2202_v25  ;;  %v3420_v56 = vand.u32 4294901760, %v2823_v58  ;;  %3422 = vst [vmem:[#allocation41_spill] sm:$0xff] %v2991_v59  ;;  %v3423_v38 = vand.u32 4294901760, %v2755_v61 }
  0x4e   :  { %2033 = vmatprep.mubr.f32.mxu0 %v3418_v21  ;;  %2299 = vmatprep.subr.bf16.mxu0 %v2298_v24  ;;  %v2989_v54 = vsub.f32 %v2699_v39, %v3421_v7  ;;  %v3424_v44 = vand.u32 4294901760, %v2905_v31  ;;  %v2210_v39 = vpack.c.bf16 %v373_v32, %v366_v16  ;;  %v3007_v21 = vld [vmem:[#allocation2 + $0x78] sm:$0xff]  ;;  %v3016_v61 = vsub.f32 %v2945_v3, %v2975_v62 }
  0x4f   :  { %v2306_v9 = vpack.c.bf16 %v371_v14, %v3420_v56  ;;  %1866 = vmatmul.mubr.f32.gmra.mrb[2].mxu1 %v193_v55  ;;  %2034 = vmatmul.mubr.f32.gmra.mrb[2].mxu0 %v3423_v38  ;;  %v3001_v14 = vsub.f32 %v2918_v33, %v2955_v51  ;;  %v3004_v56 = vand.u32 4294901760, %v2968_v28  ;;  %v380_v55 = vand.u32 4294901760, %v379_v12  ;;  %3427 = vst [vmem:[#allocation44_spill] sm:$0xff] %v3007_v21 }
  0x50   :  { %v242_v27 = vsub.f32 %v2905_v31, %v3424_v44  ;;  %2205 = vmatpush3.bf16.msra.mxu1 %v2202_v25  ;;  %2301 = vmatpush3.bf16.msra.mxu0 %v2298_v24  ;;  %v387_v7 = vand.u32 4294901760, %v386_v43  ;;  %v3428_v44 = vand.u32 4294901760, %v2807_v40  ;;  %v393_v33 = vsub.f32 %v2932_v23, %v3429_v41  ;;  %3430 = vst [vmem:[#allocation45_spill] sm:$0xff] %v3016_v61 }
  0x51   :  { %3425 = vst [vmem:[#allocation42_spill] sm:$0xff] %v3001_v14  ;;  %3426 = vst [vmem:[#allocation43_spill] sm:$0xff] %v3004_v56  ;;  %1868 = vmatprep.mubr.f32.mxu1 %v203_v53  ;;  %v3020_v25 = vand.u32 4294901760, %v2991_v59  ;;  %2207 = vmatprep.subr.bf16.mxu1 %v2206_v30  ;;  %v3432_v53 = vand.u32 4294901760, %v2943_v29  ;;  %v413_v32 = vand.u32 4294901760, %v2989_v54  ;;  %v3433_v41 = vand.u32 4294901760, %v2717_v45 }
  0x52   :  { %2036 = vmatprep.mubr.f32.mxu0 %v3428_v44  ;;  %2303 = vmatprep.subr.bf16.mxu0 %v2922_v60  ;;  %v3434_v43 = vand.u32 4294901760, %v2719_v46  ;;  %v3435_v24 = vand.u32 4294901760, %v2815_v52  ;;  %v3436_v38 = vand.u32 4294901760, %v2952_v15  ;;  %v271_v3 = vand.u32 4294901760, %v3001_v14 }
  0x53   :  { %3431 = vst [vmem:[#allocation46_spill] sm:$0xff] %v3020_v25  ;;  %v400_v16 = vsub.f32 %v2943_v29, %v3432_v53  ;;  %v3030_v12 = vsub.f32 %v2717_v45, %v3433_v41  ;;  %1869 = vmatmul.mubr.f32.gmra.mrb[4].mxu1 %v213_v8  ;;  %v3045_v40 = vsub.f32 %v2968_v28, %v3004_v56  ;;  %v3048_v45 = vand.u32 4294901760, %v3007_v21 }
  0x54   :  { %v3035_v44 = vsub.f32 %v2719_v46, %v3434_v43  ;;  %2037 = vmatmul.mubr.f32.gmra.mrb[4].mxu0 %v3435_v24  ;;  %v252_v53 = vsub.f32 %v2952_v15, %v3436_v38  ;;  %2209 = vmatpush3.bf16.msra.mxu1 %v2206_v30  ;;  %v243_v46 = vand.u32 4294901760, %v242_v27  ;;  %v2214_v8 = vpack.c.bf16 %v387_v7, %v380_v55 }
  0x55   :  { %3437 = vst [vmem:[#allocation47_spill] sm:$0xff] %v3045_v40  ;;  %2305 = vmatpush3.bf16.msra.mxu0 %v2922_v60  ;;  %v3438_v24 = vand.u32 4294901760, %v2876_v37  ;;  %v3439_v41 = vand.u32 4294901760, %v2881_v2  ;;  %v3440_v38 = vand.u32 4294901760, %v2966_v0  ;;  %1871 = vmatprep.mubr.f32.mxu1 %v223_v20  ;;  %v3441_v28 = vand.u32 4294901760, %v2854_v11 }
  0x56   :  { %v394_v56 = vand.u32 4294901760, %v393_v33  ;;  %v281_v30 = vand.u32 4294901760, %v3016_v61  ;;  %v3442_v60 = vand.u32 4294901760, %v2980_v57  ;;  %v3066_v55 = vsub.f32 %v2991_v59, %v3020_v25  ;;  %2211 = vmatprep.subr.bf16.mxu1 %v2210_v39  ;;  %2307 = vmatprep.subr.bf16.mxu0 %v2306_v9 }
  0x57   :  { %v2310_v43 = vpack.c.bf16 %v3439_v41, %v3438_v24  ;;  %v262_v52 = vsub.f32 %v2966_v0, %v3440_v38  ;;  %2039 = vmatprep.mubr.f32.mxu0 %v3441_v28  ;;  %v401_v7 = vand.u32 4294901760, %v400_v16  ;;  %v414_v24 = vsub.f32 %v2989_v54, %v413_v32  ;;  %1872 = vmatmul.mubr.f32.gmra.mrb[6].mxu1 %v233_v34 }
  0x58   :  { %v407_v27 = vsub.f32 %v2980_v57, %v3442_v60  ;;  %v420_v20 = vand.u32 4294901760, %v3030_v12  ;;  %v427_v28 = vand.u32 4294901760, %v3035_v44  ;;  %v3443_v33 = vand.u32 4294901760, %v2859_v50  ;;  %2213 = vmatpush3.bf16.msra.mxu1 %v2210_v39  ;;  %1874 = vmatprep.mubr.f32.mxu1 %v243_v46 }
  0x59   :  { %v253_v41 = vand.u32 4294901760, %v252_v53  ;;  %v272_v38 = vsub.f32 %v3001_v14, %v271_v3  ;;  %v291_v60 = vand.u32 4294901760, %v3045_v40  ;;  %v3077_v59 = vsub.f32 %v3007_v21, %v3048_v45  ;;  %2309 = vmatpush3.bf16.msra.mxu0 %v2306_v9  ;;  %2215 = vmatprep.subr.bf16.mxu1 %v2214_v8 }
  0x5a   :  { %2040 = vmatmul.mubr.f32.gmra.mrb[6].mxu0 %v3443_v33  ;;  %v263_v16 = vand.u32 4294901760, %v262_v52  ;;  %v3444_v11 = vand.u32 4294901760, %v2905_v31  ;;  %v3445_v34 = vand.u32 4294901760, %v2932_v23  ;;  %v3446_v33 = vand.u32 4294901760, %v2943_v29  ;;  %2311 = vmatprep.subr.bf16.mxu0 %v2310_v43 }
  0x5b   :  { %v282_v14 = vsub.f32 %v3016_v61, %v281_v30  ;;  %v408_v50 = vand.u32 4294901760, %v407_v27  ;;  %v301_v25 = vand.u32 4294901760, %v3066_v55  ;;  %v2218_v21 = vpack.c.bf16 %v401_v7, %v394_v56  ;;  %1875 = vmatmul.mubr.f32.gmra.mrb[8].mxu1 %v253_v41 }
  0x5c   :  { %2042 = vmatprep.mubr.f32.mxu0 %v3444_v11  ;;  %v2314_v53 = vpack.c.bf16 %v3446_v33, %v3445_v34  ;;  %v415_v39 = vand.u32 4294901760, %v414_v24  ;;  %v421_v52 = vsub.f32 %v3030_v12, %v420_v20  ;;  %v428_v9 = vsub.f32 %v3035_v44, %v427_v28  ;;  %2217 = vmatpush3.bf16.msra.mxu1 %v2214_v8 }
  0x5d   :  { %v3447_v11 = vand.u32 4294901760, %v2952_v15  ;;  %v273_v46 = vand.u32 4294901760, %v272_v38  ;;  %v292_v34 = vsub.f32 %v3045_v40, %v291_v60  ;;  %v311_v33 = vand.u32 4294901760, %v3077_v59  ;;  %2313 = vmatpush3.bf16.msra.mxu0 %v2310_v43  ;;  %1877 = vmatprep.mubr.f32.mxu1 %v263_v16 }
  0x5e   :  { %v3448_v27 = vand.u32 4294901760, %v2966_v0  ;;  %v283_v56 = vand.u32 4294901760, %v282_v14  ;;  %v302_v7 = vsub.f32 %v3066_v55, %v301_v25  ;;  %2219 = vmatprep.subr.bf16.mxu1 %v2218_v21  ;;  %2315 = vmatprep.subr.bf16.mxu0 %v2314_v53  ;;  %v2222_v24 = vpack.c.bf16 %v415_v39, %v408_v50  ;;  %v3468_v39 = vld [vmem:[#allocation20_spill] sm:$0xff] }
  0x5f   :  { %2043 = vmatmul.mubr.f32.gmra.mrb[8].mxu0 %v3447_v11  ;;  %v3449_v41 = vand.u32 4294901760, %v2980_v57  ;;  %v422_v38 = vand.u32 4294901760, %v421_v52  ;;  %v429_v61 = vand.u32 4294901760, %v428_v9  ;;  %1878 = vmatmul.mubr.f32.gmra.mrb[10].mxu1 %v273_v46  ;;  %v293_v40 = vand.u32 4294901760, %v292_v34  ;;  %v3469_v9 = vld [vmem:[#allocation23_spill] sm:$0xff]  ;;  %v3470_v46 = vld [vmem:[#allocation28_spill] sm:$0xff] }
  0x60   :  { %2045 = vmatprep.mubr.f32.mxu0 %v3448_v27  ;;  %v312_v8 = vsub.f32 %v3077_v59, %v311_v33  ;;  %2221 = vmatpush3.bf16.msra.mxu1 %v2218_v21  ;;  %v303_v14 = vand.u32 4294901760, %v302_v7  ;;  %v2322_v16 = vpack.c.bf16 %v427_v28, %v420_v20  ;;  %v3461_v21 = vld [vmem:[#allocation15_spill] sm:$0xff]  ;;  %v3465_v28 = vld [vmem:[#allocation17_spill] sm:$0xff]  ;;  %v1369_v52 = vmul.f32 %v3468_v39, %v3468_v39  ;;  %v3473_v27 = vld [vmem:[#allocation30_spill] sm:$0xff] }
  0x61   :  { %v2318_v11 = vpack.c.bf16 %v413_v32, %v3449_v41  ;;  %2317 = vmatpush3.bf16.msra.mxu0 %v2314_v53  ;;  %1880 = vmatprep.mubr.f32.mxu1 %v283_v56  ;;  %v2226_v43 = vpack.c.bf16 %v429_v61, %v422_v38  ;;  %v2234_v61 = vpack.c.bf16 %v2726_v49, %v2724_v48  ;;  %v3452_v49 = vld [vmem:[#allocation31_spill] sm:$0xff]  ;;  %v3462_v32 = vld [vmem:[#allocation13_spill] sm:$0xff]  ;;  %v3476_v7 = vld [vmem:[#allocation36_spill] sm:$0xff] }
  0x62   :  { %2223 = vmatprep.subr.bf16.mxu1 %v2222_v24  ;;  %v313_v50 = vand.u32 4294901760, %v312_v8  ;;  %v2246_v48 = vpack.c.bf16 %v2881_v2, %v2876_v37  ;;  %v3455_v2 = vld [vmem:[#allocation22_spill] sm:$0xff]  ;;  %v3457_v37 = vld [vmem:[#allocation43_spill] sm:$0xff]  ;;  %v3472_v34 = vld [vmem:[#allocation25_spill] sm:$0xff] }
  0x63   :  { %2046 = vmatmul.mubr.f32.gmra.mrb[10].mxu0 %v271_v3  ;;  %2319 = vmatprep.subr.bf16.mxu0 %v2318_v11  ;;  %v2230_v3 = vpack.c.bf16 %v2692_v36, %v2690_v35  ;;  %v2238_v35 = vpack.c.bf16 %v2777_v6, %v2772_v5  ;;  %v3450_v36 = vld [vmem:[#allocation29_spill] sm:$0xff]  ;;  %v2250_v5 = vpack.c.bf16 %v2943_v29, %v2932_v23  ;;  %v3458_v23 = vld [vmem:[#allocation46_spill] sm:$0xff]  ;;  %v3459_v29 = vld [vmem:[#allocation27_spill] sm:$0xff] }
  0x64   :  { %2048 = vmatprep.mubr.f32.mxu0 %v281_v30  ;;  %1881 = vmatmul.mubr.f32.gmra.mrb[12].mxu1 %v293_v40  ;;  %v2254_v6 = vpack.c.bf16 %v2989_v54, %v2980_v57  ;;  %v3456_v40 = vld [vmem:[#allocation26_spill] sm:$0xff]  ;;  %v3460_v54 = vld [vmem:[#allocation11_spill] sm:$0xff]  ;;  %v3464_v30 = vld [vmem:[#allocation16_spill] sm:$0xff] }
  0x65   :  { %2225 = vmatpush3.bf16.msra.mxu1 %v2222_v24  ;;  %2321 = vmatpush3.bf16.msra.mxu0 %v2318_v11  ;;  %v1364_v57 = vmul.f32 %v3460_v54, %v3460_v54  ;;  %v1367_v20 = vmul.f32 %v3464_v30, %v3464_v30  ;;  %v3467_v53 = vld [vmem:[#allocation19_spill] sm:$0xff]  ;;  %v3474_v56 = vld [vmem:[#allocation33_spill] sm:$0xff]  ;;  %v1373_v24 = vmul.f32 %v3476_v7, %v3476_v7  ;;  %v3477_v41 = vld [vmem:[#allocation34_spill] sm:$0xff] }
  0x66   :  { %1883 = vmatprep.mubr.f32.mxu1 %v303_v14  ;;  %2227 = vmatprep.subr.bf16.mxu1 %v2226_v43  ;;  %v3479_v38 = vld [vmem:[#allocation38_spill] sm:$0xff] }
  0x67   :  { %2049 = vmatmul.mubr.f32.gmra.mrb[12].mxu0 %v291_v60  ;;  %2323 = vmatprep.subr.bf16.mxu0 %v2322_v16  ;;  %v3466_v60 = vld [vmem:[#allocation21_spill] sm:$0xff]  ;;  %v1375_v8 = vmul.f32 %v3479_v38, %v3479_v38 }
  0x68   :  { %2051 = vmatprep.mubr.f32.mxu0 %v301_v25  ;;  %1884 = vmatmul.mubr.f32.gmra.mrb[14].mxu1 %v313_v50  ;;  %v1366_v25 = vmul.f32 %v3461_v21, %v3461_v21  ;;  %v3482_v50 = vld [vmem:[#allocation42_spill] sm:$0xff] }
  0x69   :  { %2229 = vmatpush3.bf16.msra.mxu1 %v2226_v43  ;;  %2325 = vmatpush3.bf16.msra.mxu0 %v2322_v16  ;;  %v3481_v43 = vld [vmem:[#allocation40_spill] sm:$0xff] }
  0x6a   :  { %1918 = vmatprep.mubr.f32.mxu1 %v2643_v17  ;;  %2231 = vmatprep.subr.bf16.mxu1 %v2230_v3  ;;  %v1377_v16 = vmul.f32 %v3481_v43, %v3481_v43 }
  0x6b   :  { %2052 = vmatmul.mubr.f32.gmra.mrb[14].mxu0 %v311_v33  ;;  %2327 = vmatprep.subr.bf16.mxu0 %v2626_v10  ;;  %v1371_v33 = vmul.f32 %v3472_v34, %v3472_v34 }
  0x6c   :  { %2086 = vmatprep.mubr.f32.mxu0 %v2643_v17  ;;  %1919 = vmatmul.mubr.f32.vlgmr.msra.gmra.mrb[0].mxu1 %v2669_v26 }
  0x6d   :  { %2233 = vmatpush3.bf16.msra.mxu1 %v2230_v3  ;;  %1921 = vmatprep.mubr.f32.mxu1 %v2706_v42  ;;  %v3483_v3 = vld [vmem:[#allocation45_spill] sm:$0xff] }
  0x6e   :  { %2235 = vmatprep.subr.bf16.mxu1 %v2234_v61  ;;  %1380 = vadd.xlane.f32.xlu0 %v1364_v57 }
  0x6f   :  { %2087 = vmatmul.mubr.f32.vlgmr.msra.gmra.mrb[0].mxu0 %v2669_v26  ;;  %1384 = vadd.xlane.f32.xlu1 %v1366_v25 }
  0x70   :  { %2329 = vmatpush3.bf16.msra.mxu0 %v2626_v10  ;;  %2089 = vmatprep.mubr.f32.mxu0 %v2706_v42  ;;  %v2242_v10 = vpack.c.bf16 %v2840_v19, %v2823_v58  ;;  %v3453_v58 = vld [vmem:[#allocation35_spill] sm:$0xff]  ;;  %v2258_v19 = vpack.c.bf16 %v3035_v44, %v3030_v12  ;;  %v3463_v12 = vld [vmem:[#allocation12_spill] sm:$0xff] }
  0x71   :  { %2331 = vmatprep.subr.bf16.mxu0 %v2630_v13  ;;  %1922 = vmatmul.mubr.f32.gmra.mrb[2].mxu1 %v2722_v47  ;;  %v1365_v44 = vmul.f32 %v3463_v12, %v3463_v12 }
  0x72   :  { %2237 = vmatpush3.bf16.msra.mxu1 %v2234_v61  ;;  %1924 = vmatprep.mubr.f32.mxu1 %v2759_v63  ;;  %v3486_v61 = vld [vmem:[#allocation47_spill] sm:$0xff] }
  0x73   :  { %2090 = vmatmul.mubr.f32.gmra.mrb[2].mxu0 %v2722_v47  ;;  %2239 = vmatprep.subr.bf16.mxu1 %v2238_v35 }
  0x74   :  { %2333 = vmatpush3.bf16.msra.mxu0 %v2630_v13  ;;  %2092 = vmatprep.mubr.f32.mxu0 %v2759_v63  ;;  %v3451_v13 = vld [vmem:[#allocation14_spill] sm:$0xff] }
  0x75   :  { %2335 = vmatprep.subr.bf16.mxu0 %v2651_v18  ;;  %1925 = vmatmul.mubr.f32.gmra.mrb[4].mxu1 %v2763_v1 }
  0x76   :  { %2241 = vmatpush3.bf16.msra.mxu1 %v2238_v35  ;;  %1927 = vmatprep.mubr.f32.mxu1 %v3450_v36 }
  0x77   :  { %2093 = vmatmul.mubr.f32.gmra.mrb[4].mxu0 %v2763_v1  ;;  %2243 = vmatprep.subr.bf16.mxu1 %v2242_v10 }
  0x78   :  { %2337 = vmatpush3.bf16.msra.mxu0 %v2651_v18  ;;  %2095 = vmatprep.mubr.f32.mxu0 %v3450_v36  ;;  %v3454_v18 = vld [vmem:[#allocation18_spill] sm:$0xff] }
  0x79   :  { %2339 = vmatprep.subr.bf16.mxu0 %v3451_v13  ;;  %1928 = vmatmul.mubr.f32.gmra.mrb[6].mxu1 %v3452_v49 }
  0x7a   :  { %2245 = vmatpush3.bf16.msra.mxu1 %v2242_v10  ;;  %1930 = vmatprep.mubr.f32.mxu1 %v3453_v58 }
  0x7b   :  { %2096 = vmatmul.mubr.f32.gmra.mrb[6].mxu0 %v3452_v49  ;;  %2247 = vmatprep.subr.bf16.mxu1 %v2246_v48 }
  0x7c   :  { %2341 = vmatpush3.bf16.msra.mxu0 %v3451_v13  ;;  %2098 = vmatprep.mubr.f32.mxu0 %v3453_v58 }
  0x7d   :  { %2343 = vmatprep.subr.bf16.mxu0 %v3454_v18  ;;  %1931 = vmatmul.mubr.f32.gmra.mrb[8].mxu1 %v2908_v22 }
  0x7e   :  { %2249 = vmatpush3.bf16.msra.mxu1 %v2246_v48  ;;  %1933 = vmatprep.mubr.f32.mxu1 %v2916_v4 }
  0x7f   :  { %2099 = vmatmul.mubr.f32.gmra.mrb[8].mxu0 %v2908_v22  ;;  %2251 = vmatprep.subr.bf16.mxu1 %v2250_v5 }
  0x80   :  { %2345 = vmatpush3.bf16.msra.mxu0 %v3454_v18  ;;  %2101 = vmatprep.mubr.f32.mxu0 %v2916_v4 }
  0x81   :  { %2347 = vmatprep.subr.bf16.mxu0 %v3455_v2  ;;  %1934 = vmatmul.mubr.f32.gmra.mrb[10].mxu1 %v2955_v51 }
  0x82   :  { %2253 = vmatpush3.bf16.msra.mxu1 %v2250_v5  ;;  %1936 = vmatprep.mubr.f32.mxu1 %v2975_v62 }
  0x83   :  { %2102 = vmatmul.mubr.f32.gmra.mrb[10].mxu0 %v2955_v51  ;;  %2255 = vmatprep.subr.bf16.mxu1 %v2254_v6 }
  0x84   :  { %2349 = vmatpush3.bf16.msra.mxu0 %v3455_v2  ;;  %2104 = vmatprep.mubr.f32.mxu0 %v2975_v62 }
  0x85   :  { %2351 = vmatprep.subr.bf16.mxu0 %v3456_v40  ;;  %1937 = vmatmul.mubr.f32.gmra.mrb[12].mxu1 %v3457_v37 }
  0x86   :  { %2257 = vmatpush3.bf16.msra.mxu1 %v2254_v6  ;;  %1939 = vmatprep.mubr.f32.mxu1 %v3458_v23 }
  0x87   :  { %2105 = vmatmul.mubr.f32.gmra.mrb[12].mxu0 %v3457_v37  ;;  %2259 = vmatprep.subr.bf16.mxu1 %v2258_v19 }
  0x88   :  { %2353 = vmatpush3.bf16.msra.mxu0 %v3456_v40  ;;  %2107 = vmatprep.mubr.f32.mxu0 %v3458_v23 }
  0x89   :  { %2355 = vmatprep.subr.bf16.mxu0 %v3459_v29  ;;  %1940 = vmatmul.mubr.f32.gmra.mrb[14].mxu1 %v3048_v45 }
  0x8a   :  { %2261 = vmatpush3.bf16.msra.mxu1 %v2258_v19  ;;  %1974 = vmatprep.mubr.f32.mxu1 %v3462_v32 }
  0x8b   :  { %2108 = vmatmul.mubr.f32.gmra.mrb[14].mxu0 %v3048_v45  ;;  %1382 = vadd.xlane.f32.xlu0 %v1365_v44 }
  0x8c   :  { %2357 = vmatpush3.bf16.msra.mxu0 %v3459_v29  ;;  %2142 = vmatprep.mubr.f32.mxu0 %v2643_v17  ;;  %v1368_v17 = vmul.f32 %v3467_v53, %v3467_v53 }
  0x8d   :  { %1975 = vmatmul.mubr.f32.vlgmr.msra.gmra.mrb[0].mxu1 %v3465_v28  ;;  %1386 = vadd.xlane.f32.xlu1 %v1367_v20 }
  0x8e   :  { %1977 = vmatprep.mubr.f32.mxu1 %v3466_v60 }
  0x8f   :  { %2143 = vmatmul.mubr.f32.vlgmr.msra.gmra.mrb[0].mxu0 %v2669_v26  ;;  %1388 = vadd.xlane.f32.xlu0 %v1368_v17  ;;  %v3471_v26 = vld [vmem:[#allocation24_spill] sm:$0xff] }
  0x90   :  { %2145 = vmatprep.mubr.f32.mxu0 %v2706_v42  ;;  %v1370_v42 = vmul.f32 %v3471_v26, %v3471_v26 }
  0x91   :  { %1978 = vmatmul.mubr.f32.gmra.mrb[2].mxu1 %v3469_v9  ;;  %1390 = vadd.xlane.f32.xlu1 %v1369_v52 }
  0x92   :  { %1980 = vmatprep.mubr.f32.mxu1 %v3470_v46 }
  0x93   :  { %2146 = vmatmul.mubr.f32.gmra.mrb[2].mxu0 %v2722_v47  ;;  %1392 = vadd.xlane.f32.xlu0 %v1370_v42  ;;  %v3475_v47 = vld [vmem:[#allocation32_spill] sm:$0xff] }
  0x94   :  { %2148 = vmatprep.mubr.f32.mxu0 %v2759_v63  ;;  %v1372_v63 = vmul.f32 %v3475_v47, %v3475_v47 }
  0x95   :  { %1981 = vmatmul.mubr.f32.gmra.mrb[4].mxu1 %v3473_v27  ;;  %1394 = vadd.xlane.f32.xlu1 %v1371_v33 }
  0x96   :  { %1983 = vmatprep.mubr.f32.mxu1 %v3474_v56 }
  0x97   :  { %2149 = vmatmul.mubr.f32.gmra.mrb[4].mxu0 %v2763_v1  ;;  %1396 = vadd.xlane.f32.xlu0 %v1372_v63  ;;  %v3478_v1 = vld [vmem:[#allocation37_spill] sm:$0xff] }
  0x98   :  { %2151 = vmatprep.mubr.f32.mxu0 %v3450_v36  ;;  %v1374_v11 = vmul.f32 %v3478_v1, %v3478_v1 }
  0x99   :  { %1984 = vmatmul.mubr.f32.gmra.mrb[6].mxu1 %v3477_v41  ;;  %1398 = vadd.xlane.f32.xlu1 %v1373_v24 }
  0x9a   :  { %1986 = vmatprep.mubr.f32.mxu1 %v2905_v31  ;;  %v3480_v31 = vld [vmem:[#allocation39_spill] sm:$0xff] }
  0x9b   :  { %2152 = vmatmul.mubr.f32.gmra.mrb[6].mxu0 %v3452_v49  ;;  %1400 = vadd.xlane.f32.xlu0 %v1374_v11  ;;  %v1376_v14 = vmul.f32 %v3480_v31, %v3480_v31 }
  0x9c   :  { %2154 = vmatprep.mubr.f32.mxu0 %v3453_v58 }
  0x9d   :  { %1987 = vmatmul.mubr.f32.gmra.mrb[8].mxu1 %v2952_v15  ;;  %1402 = vadd.xlane.f32.xlu1 %v1375_v8  ;;  %v3485_v15 = vld [vmem:[#allocation44_spill] sm:$0xff] }
  0x9e   :  { %1989 = vmatprep.mubr.f32.mxu1 %v2966_v0  ;;  %v1379_v0 = vmul.f32 %v3485_v15, %v3485_v15 }
  0x9f   :  { %2155 = vmatmul.mubr.f32.gmra.mrb[8].mxu0 %v2908_v22  ;;  %1404 = vadd.xlane.f32.xlu0 %v1376_v14  ;;  %v3484_v22 = vld [vmem:[#allocation41_spill] sm:$0xff] }
  0xa0   :  { %2157 = vmatprep.mubr.f32.mxu0 %v2916_v4  ;;  %v1378_v4 = vmul.f32 %v3484_v22, %v3484_v22 }
  0xa1   :  { %1990 = vmatmul.mubr.f32.gmra.mrb[10].mxu1 %v3482_v50  ;;  %1406 = vadd.xlane.f32.xlu1 %v1377_v16 }
  0xa2   :  { %1992 = vmatprep.mubr.f32.mxu1 %v3483_v3 }
  0xa3   :  { %2158 = vmatmul.mubr.f32.gmra.mrb[10].mxu0 %v2955_v51  ;;  %v1636_v51 = vld [vmem:[%s3296_s1] ss:$0 sm:$0xff]  ;;  %1408 = vadd.xlane.f32.xlu0 %v1378_v4 }
  0xa4   :  { %2160 = vmatprep.mubr.f32.mxu0 %v2975_v62  ;;  %v1419_v62 = vmul.f32 %v1636_v51, %v3460_v54  ;;  %v1420_v35 = vmul.f32 %v1636_v51, %v3463_v12  ;;  %v1421_v10 = vmul.f32 %v1636_v51, %v3461_v21  ;;  %v1422_v36 = vmul.f32 %v1636_v51, %v3464_v30 }
  0xa5   :  { %1993 = vmatmul.mubr.f32.gmra.mrb[12].mxu1 %v3486_v61  ;;  %1410 = vadd.xlane.f32.xlu1 %v1379_v0  ;;  %v1423_v13 = vmul.f32 %v1636_v51, %v3467_v53  ;;  %v1426_v48 = vmul.f32 %v1636_v51, %v3472_v34  ;;  %v1427_v49 = vmul.f32 %v1636_v51, %v3475_v47 }
  0xa6   :  { %1995 = vmatprep.mubr.f32.mxu1 %v3066_v55  ;;  %v1424_v55 = vmul.f32 %v1636_v51, %v3468_v39  ;;  %v1430_v58 = vmul.f32 %v1636_v51, %v3479_v38  ;;  %v1429_v18 = vmul.f32 %v1636_v51, %v3478_v1  ;;  %v1432_v5 = vmul.f32 %v1636_v51, %v3481_v43 }
  0xa7   :  { %2161 = vmatmul.mubr.f32.gmra.mrb[12].mxu0 %v3457_v37  ;;  %1435 = vadd.xlane.f32.xlu0 %v1419_v62  ;;  %v1431_v2 = vmul.f32 %v1636_v51, %v3480_v31  ;;  %v1434_v6 = vmul.f32 %v1636_v51, %v3485_v15  ;;  %v1433_v40 = vmul.f32 %v1636_v51, %v3484_v22 }
  0xa8   :  { %2163 = vmatprep.mubr.f32.mxu0 %v3458_v23 }
  0xa9   :  { %1996 = vmatmul.mubr.f32.gmra.mrb[14].mxu1 %v3077_v59  ;;  %1437 = vadd.xlane.f32.xlu1 %v1420_v35  ;;  %v1425_v59 = vmul.f32 %v1636_v51, %v3471_v26 }
  0xab   :  { %2164 = vmatmul.mubr.f32.gmra.mrb[14].mxu0 %v3048_v45  ;;  %1439 = vadd.xlane.f32.xlu0 %v1421_v10  ;;  %v1428_v45 = vmul.f32 %v1636_v51, %v3476_v7 }
  0xad   :  { %1441 = vadd.xlane.f32.xlu1 %v1422_v36 }
  0xaf   :  { %1443 = vadd.xlane.f32.xlu0 %v1423_v13 }
  0xb1   :  { %1445 = vadd.xlane.f32.xlu1 %v1424_v55 }
  0xb3   :  { %1447 = vadd.xlane.f32.xlu0 %v1425_v59 }
  0xb5   :  { %1449 = vadd.xlane.f32.xlu1 %v1426_v48 }
  0xb7   :  { %1451 = vadd.xlane.f32.xlu0 %v1427_v49 }
  0xb9   :  { %1453 = vadd.xlane.f32.xlu1 %v1428_v45 }
  0xbb   :  { %1455 = vadd.xlane.f32.xlu0 %v1429_v18 }
  0xbd   :  { %1457 = vadd.xlane.f32.xlu1 %v1430_v58 }
  0xbf   :  { %1459 = vadd.xlane.f32.xlu0 %v1431_v2 }
  0xc1   :  { %1461 = vadd.xlane.f32.xlu1 %v1432_v5 }
  0xc3   :  { %1463 = vadd.xlane.f32.xlu0 %v1433_v40 }
  0xc5   :  { %1465 = vadd.xlane.f32.xlu1 %v1434_v6 }
  0xfb   :  { %v1381_v19 = vpop.xlane.xlu0 %1380 }
  0xfc   :  { %v1385_v37 = vpop.xlane.xlu1 %1384  ;;  %v1467_v9 = vmax.f32 %v1381_v19, 1e-24 }
  0xfd   :  { %v1469_v42 = vmax.f32 %v1385_v37, 1e-24 }
 0x118   :  { %v1383_v23 = vpop.xlane.xlu0 %1382 }
 0x119   :  { %v1468_v52 = vmax.f32 %v1383_v23, 1e-24 }
 0x11a   :  { %v1387_v29 = vpop.xlane.xlu1 %1386 }
 0x11b   :  { %2443 = vrsqrt.f32 %v1468_v52  ;;  %v1470_v26 = vmax.f32 %v1387_v29, 1e-24 }
 0x11c   :  { %v1389_v57 = vpop.xlane.xlu0 %1388  ;;  %2445 = vrsqrt.f32 %v1467_v9 }
 0x11d   :  { %v1471_v33 = vmax.f32 %v1389_v57, 1e-24  ;;  %2447 = vrsqrt.f32 %v1470_v26 }
 0x11e   :  { %v1391_v54 = vpop.xlane.xlu1 %1390  ;;  %2449 = vrsqrt.f32 %v1469_v42 }
 0x11f   :  { %v1472_v27 = vmax.f32 %v1391_v54, 1e-24  ;;  %2451 = vrsqrt.f32 %v1471_v33  ;;  %v2476_v33 = vld [vmem:[#allocation2] sm:$0xff] }
 0x120   :  { %v1393_v25 = vpop.xlane.xlu0 %1392 }
 0x121   :  { %2453 = vrsqrt.f32 %v1472_v27  ;;  %v1473_v7 = vmax.f32 %v1393_v25, 1e-24 }
 0x122   :  { %v1395_v21 = vpop.xlane.xlu1 %1394 }
 0x123   :  { %v1474_v63 = vmax.f32 %v1395_v21, 1e-24 }
 0x124   :  { %v1397_v12 = vpop.xlane.xlu0 %1396 }
 0x125   :  { %v2444_v24 = vpop.eup %2443  ;;  %2455 = vrsqrt.f32 %v1474_v63  ;;  %v1475_v8 = vmax.f32 %v1397_v12, 1e-24 }
 0x126   :  { %v1399_v32 = vpop.xlane.xlu1 %1398  ;;  %v2446_v41 = vpop.eup %2445  ;;  %2457 = vrsqrt.f32 %v1473_v7 }
 0x127   :  { %v1476_v38 = vmax.f32 %v1399_v32, 1e-24  ;;  %v2448_v14 = vpop.eup %2447 }
 0x128   :  { %v1401_v30 = vpop.xlane.xlu0 %1400  ;;  %v2450_v50 = vpop.eup %2449 }
 0x129   :  { %v1477_v43 = vmax.f32 %v1401_v30, 1e-24  ;;  %v2452_v22 = vpop.eup %2451  ;;  %2459 = vrsqrt.f32 %v1476_v38 }
 0x12a   :  { %v1403_v44 = vpop.xlane.xlu1 %1402  ;;  %2461 = vrsqrt.f32 %v1475_v8 }
 0x12b   :  { %v1478_v3 = vmax.f32 %v1403_v44, 1e-24  ;;  %v2454_v4 = vpop.eup %2453  ;;  %2463 = vrsqrt.f32 %v1477_v43  ;;  %v3260_v44 = vld [vmem:[%s3298_s3] ss:$0 sm:$0xff]  ;;  %s2566_s3 = smov [#allocation7]  }
 0x12c   :  { %v1405_v28 = vpop.xlane.xlu0 %1404  ;;  %s1623_s16 = sshll.u32 %s2566_s3, 4  ;;  %s1624_s16 = int_to_ptr.vmem [resolvable:$true] %s1623_s16 }
 0x12d   :  { %v1479_v35 = vmax.f32 %v1405_v28, 1e-24  ;;  %2465 = vrsqrt.f32 %v1478_v3  ;;  %s2534_s17 = scalar_lea.vmem %s1624_s16, 2048  ;;  %p2539_p3 = scmp.lt.s32.totalorder %s1624_s16, %s1624_s16 }
 0x12e   :  { %v3246_v20 = vpop.xlane.xlu1 %1406  ;;  %p2535_p2 = scmp.ne.s32.totalorder %s1624_s16, %s2534_s17  ;;  %p2540_p4 = scmp.lt.s32.totalorder %s2534_s17, %s2534_s17 }
 0x12f   :  { %v1480_v55 = vmax.f32 %v3246_v20, 1e-24  ;;  %v2456_v40 = vpop.eup %2455  ;;  %2467 = vrsqrt.f32 %v1479_v35 }
 0x130   :  { %v3250_v53 = vpop.xlane.xlu0 %1408  ;;  %v2458_v29 = vpop.eup %2457  ;;  %p2541_p5 = por %p2540_p4, %p2539_p3 }
 0x131   :  { %v1481_v13 = vmax.f32 %v3250_v53, 1e-24  ;;  %2469 = vrsqrt.f32 %v1480_v55 }
 0x132   :  { %v3248_v60 = vpop.xlane.xlu1 %1410  ;;  %p2542_p6 = pnand %p2541_p5, %p2535_p2 }
 0x133   :  { %v1482_v54 = vmax.f32 %v3248_v60, 1e-24  ;;  %2471 = vrsqrt.f32 %v1481_v13  ;;  %v2460_v26 = vpop.eup %2459 }
 0x134   :  { %v1436_v39 = vpop.xlane.xlu0 %1435 }
 0x135   :  { %v1499_v16 = vmul.f32 %v2446_v41, %v1436_v39  ;;  %v2475_v39 = vld [vmem:[#allocation2 + $0x8] sm:$0xff]  ;;  %2473 = vrsqrt.f32 %v1482_v54 }
 0x136   :  { %v1438_v17 = vpop.xlane.xlu1 %1437 }
 0x137   :  { %v1500_v31 = vmul.f32 %v2444_v24, %v1438_v17  ;;  %v1515_v10 = vmax.f32 %v1499_v16, 0.0 }
 0x138   :  { %v1440_v34 = vpop.xlane.xlu0 %1439 }
 0x139   :  { %v1516_v0 = vmax.f32 %v1500_v31, 0.0  ;;  %v1501_v36 = vmul.f32 %v2450_v50, %v1440_v34  ;;  %v1531_v19 = vmin.f32 %v1515_v10, 1.0  ;;  %v2478_v10 = vld [vmem:[#allocation2 + $0x10] sm:$0xff] }
 0x13a   :  { %v1442_v46 = vpop.xlane.xlu1 %1441 }
 0x13b   :  { %v1502_v61 = vmul.f32 %v2448_v14, %v1442_v46  ;;  %v1532_v58 = vmin.f32 %v1516_v0, 1.0  ;;  %v1517_v37 = vmax.f32 %v1501_v36, 0.0 }
 0x13c   :  { %v1444_v47 = vpop.xlane.xlu0 %1443 }
 0x13d   :  { %v1503_v59 = vmul.f32 %v2452_v22, %v1444_v47  ;;  %v1518_v18 = vmax.f32 %v1502_v61, 0.0  ;;  %v1533_v42 = vmin.f32 %v1517_v37, 1.0  ;;  %v2462_v47 = vpop.eup %2461  ;;  %v2479_v37 = vld [vmem:[#allocation2 + $0x28] sm:$0xff] }
 0x13e   :  { %v1446_v56 = vpop.xlane.xlu1 %1445  ;;  %v2464_v24 = vpop.eup %2463 }
 0x13f   :  { %v1504_v48 = vmul.f32 %v2454_v4, %v1446_v56  ;;  %v1519_v12 = vmax.f32 %v1503_v59, 0.0  ;;  %v1534_v53 = vmin.f32 %v1518_v18, 1.0  ;;  %v2466_v43 = vpop.eup %2465 }
 0x140   :  { %v1448_v11 = vpop.xlane.xlu0 %1447 }
 0x141   :  { %v1520_v32 = vmax.f32 %v1504_v48, 0.0  ;;  %v1505_v34 = vmul.f32 %v2458_v29, %v1448_v11  ;;  %v1535_v38 = vmin.f32 %v1519_v12, 1.0  ;;  %v2477_v11 = vld [vmem:[#allocation2 + $0x18] sm:$0xff] }
 0x142   :  { %v1450_v1 = vpop.xlane.xlu1 %1449 }
 0x143   :  { %v1506_v17 = vmul.f32 %v2456_v40, %v1450_v1  ;;  %v1536_v41 = vmin.f32 %v1520_v32, 1.0  ;;  %v1521_v61 = vmax.f32 %v1505_v34, 0.0 }
 0x144   :  { %v3252_v62 = vpop.xlane.xlu0 %1451 }
 0x145   :  { %v1522_v16 = vmax.f32 %v1506_v17, 0.0  ;;  %v1507_v35 = vmul.f32 %v2462_v47, %v3252_v62  ;;  %v1537_v12 = vmin.f32 %v1521_v61, 1.0 }
 0x146   :  { %v1454_v51 = vpop.xlane.xlu1 %1453 }
 0x147   :  { %v1508_v50 = vmul.f32 %v2460_v26, %v1454_v51 }
 0x148   :  { %v1456_v21 = vpop.xlane.xlu0 %1455 }
 0x149   :  { %v1524_v62 = vmax.f32 %v1508_v50, 0.0 }
 0x14a   :  { %v1458_v57 = vpop.xlane.xlu1 %1457 }
 0x14b   :  { %v1510_v51 = vmul.f32 %v2466_v43, %v1458_v57  ;;  %v2480_v57 = vld [vmem:[#allocation2 + $0x20] sm:$0xff] }
 0x14c   :  { %v1460_v48 = vpop.xlane.xlu0 %1459 }
 0x14d   :  { %v1526_v17 = vmax.f32 %v1510_v51, 0.0 }
 0x14e   :  { %v1462_v13 = vpop.xlane.xlu1 %1461 }
 0x160   :  { %v1976_v45 = vpop.f32.mrb[0].mxu1 }
 0x161   :  { %v660_v2 = vpop.f32.mrb[1].mxu1 }
 0x162   :  { %v2144_v49 = vpop.f32.mrb[0].mxu0 }
 0x163   :  { %v2358_v5 = vadd.f32 %v2144_v49, %v1976_v45  ;;  %v1270_v6 = vpop.f32.mrb[1].mxu0  ;;  %v2468_v49 = vpop.eup %2467 }
 0x164   :  { %v2359_v23 = vadd.f32 %v1270_v6, %v660_v2  ;;  %v1979_v20 = vpop.f32.mrb[2].mxu1  ;;  %v2470_v40 = vpop.eup %2469 }
 0x165   :  { %v1548_v25 = vmul.f32 %v2358_v5, %v1532_v58  ;;  %v674_v60 = vpop.f32.mrb[3].mxu1  ;;  %v1509_v58 = vmul.f32 %v2464_v24, %v1456_v21  ;;  %v2472_v32 = vpop.eup %2471  ;;  %v1512_v34 = vmul.f32 %v2470_v40, %v1462_v13  ;;  %v1511_v24 = vmul.f32 %v2468_v49, %v1460_v48 }
 0x166   :  { %v1547_v30 = vmul.f32 %v2359_v23, %v1531_v19  ;;  %v2147_v28 = vpop.f32.mrb[2].mxu0  ;;  %v1538_v19 = vmin.f32 %v1522_v16, 1.0  ;;  %v2474_v26 = vpop.eup %2473  ;;  %v1542_v16 = vmin.f32 %v1526_v17, 1.0 }
 0x167   :  { %v1564_v52 = vadd.f32 %v2475_v39, %v1548_v25  ;;  %v2360_v9 = vadd.f32 %v2147_v28, %v1979_v20  ;;  %v1282_v46 = vpop.f32.mrb[3].mxu0  ;;  %v1525_v39 = vmax.f32 %v1509_v58, 0.0  ;;  %v1527_v48 = vmax.f32 %v1511_v24, 0.0 }
 0x168   :  { %v1563_v27 = vadd.f32 %v2476_v33, %v1547_v30  ;;  %v2361_v56 = vadd.f32 %v1282_v46, %v674_v60  ;;  %v1982_v31 = vpop.f32.mrb[4].mxu1  ;;  %v1523_v30 = vmax.f32 %v1507_v35, 0.0  ;;  %v2481_v33 = vld [vmem:[#allocation2 + $0x38] sm:$0xff]  ;;  %v2483_v35 = vld [vmem:[#allocation2 + $0x48] sm:$0xff] }
 0x169   :  { %v1587_v63 = vadd.f32 %v3260_v44, %v1564_v52  ;;  %v1550_v7 = vmul.f32 %v2360_v9, %v1534_v53  ;;  %v688_v4 = vpop.f32.mrb[5].mxu1  ;;  %v1541_v50 = vmin.f32 %v1525_v39, 1.0 }
 0x16a   :  { %v1586_v1 = vadd.f32 %v3260_v44, %v1563_v27  ;;  %v1549_v8 = vmul.f32 %v2361_v56, %v1533_v42  ;;  %v2150_v14 = vpop.f32.mrb[4].mxu0  ;;  %v1540_v42 = vmin.f32 %v1524_v62, 1.0 }
 0x16b   :  { %1603 = vst [vmem:[#allocation7 + $0x8] sm:$0xff] %v1587_v63  ;;  %v1566_v3 = vadd.f32 %v2477_v11, %v1550_v7  ;;  %v2362_v22 = vadd.f32 %v2150_v14, %v1982_v31  ;;  %v1294_v0 = vpop.f32.mrb[5].mxu0  ;;  %v1539_v7 = vmin.f32 %v1523_v30, 1.0  ;;  %v1464_v31 = vpop.xlane.xlu0 %1463  ;;  %v2486_v30 = vld [vmem:[#allocation2 + $0x50] sm:$0xff] }
 0x16c   :  { %1602 = vst [vmem:[#allocation7] sm:$0xff] %v1586_v1  ;;  %v1565_v36 = vadd.f32 %v2478_v10, %v1549_v8  ;;  %v2363_v55 = vadd.f32 %v1294_v0, %v688_v4  ;;  %v1985_v2 = vpop.f32.mrb[6].mxu1  ;;  %v1528_v0 = vmax.f32 %v1512_v34, 0.0 }
 0x16d   :  { %v1589_v59 = vadd.f32 %v3260_v44, %v1566_v3  ;;  %v1552_v45 = vmul.f32 %v2362_v22, %v1536_v41  ;;  %v702_v54 = vpop.f32.mrb[7].mxu1  ;;  %v1466_v41 = vpop.xlane.xlu1 %1465 }
 0x16e   :  { %v1588_v18 = vadd.f32 %v3260_v44, %v1565_v36  ;;  %v1551_v5 = vmul.f32 %v2363_v55, %v1535_v38  ;;  %v2153_v6 = vpop.f32.mrb[6].mxu0  ;;  %v2482_v38 = vld [vmem:[#allocation2 + $0x30] sm:$0xff]  ;;  %v1514_v61 = vmul.f32 %v2474_v26, %v1466_v41 }
 0x16f   :  { %1605 = vst [vmem:[#allocation7 + $0x18] sm:$0xff] %v1589_v59  ;;  %v1568_v23 = vadd.f32 %v2479_v37, %v1552_v45  ;;  %v2364_v29 = vadd.f32 %v2153_v6, %v1985_v2  ;;  %v1306_v25 = vpop.f32.mrb[7].mxu0  ;;  %v1513_v59 = vmul.f32 %v2472_v32, %v1464_v31  ;;  %v2484_v45 = vld [vmem:[#allocation2 + $0x40] sm:$0xff]  ;;  %v2485_v37 = vld [vmem:[#allocation2 + $0x58] sm:$0xff]  ;;  %v1543_v32 = vmin.f32 %v1527_v48, 1.0 }
 0x170   :  { %1604 = vst [vmem:[#allocation7 + $0x10] sm:$0xff] %v1588_v18  ;;  %v1567_v21 = vadd.f32 %v2480_v57, %v1551_v5  ;;  %v2365_v20 = vadd.f32 %v1306_v25, %v702_v54  ;;  %v1988_v60 = vpop.f32.mrb[8].mxu1  ;;  %v1530_v62 = vmax.f32 %v1514_v61, 0.0 }
 0x171   :  { %v1591_v28 = vadd.f32 %v3260_v44, %v1568_v23  ;;  %v1554_v53 = vmul.f32 %v2364_v29, %v1538_v19  ;;  %v716_v47 = vpop.f32.mrb[9].mxu1  ;;  %v1544_v19 = vmin.f32 %v1528_v0, 1.0 }
 0x172   :  { %v1590_v52 = vadd.f32 %v3260_v44, %v1567_v21  ;;  %v1553_v9 = vmul.f32 %v2365_v20, %v1537_v12  ;;  %v2156_v46 = vpop.f32.mrb[8].mxu0  ;;  %v1529_v12 = vmax.f32 %v1513_v59, 0.0 }
 0x173   :  { %1607 = vst [vmem:[#allocation7 + $0x28] sm:$0xff] %v1591_v28  ;;  %v1570_v27 = vadd.f32 %v2481_v33, %v1554_v53  ;;  %v2366_v56 = vadd.f32 %v2156_v46, %v1988_v60  ;;  %v1318_v63 = vpop.f32.mrb[9].mxu0  ;;  %v2487_v60 = vld [vmem:[#allocation2 + $0x68] sm:$0xff] }
 0x174   :  { %1606 = vst [vmem:[#allocation7 + $0x20] sm:$0xff] %v1590_v52  ;;  %v1569_v1 = vadd.f32 %v2482_v38, %v1553_v9  ;;  %v2367_v8 = vadd.f32 %v1318_v63, %v716_v47  ;;  %v1991_v22 = vpop.f32.mrb[10].mxu1  ;;  %v1546_v9 = vmin.f32 %v1530_v62, 1.0  ;;  %v1545_v33 = vmin.f32 %v1529_v12, 1.0 }
 0x175   :  { %v1593_v14 = vadd.f32 %v3260_v44, %v1570_v27  ;;  %v1556_v43 = vmul.f32 %v2366_v56, %v1540_v42  ;;  %v730_v55 = vpop.f32.mrb[11].mxu1  ;;  %v2488_v27 = vld [vmem:[#allocation2 + $0x60] sm:$0xff] }
 0x176   :  { %v1592_v11 = vadd.f32 %v3260_v44, %v1569_v1  ;;  %v1555_v3 = vmul.f32 %v2367_v8, %v1539_v7  ;;  %v2159_v4 = vpop.f32.mrb[10].mxu0  ;;  %v2489_v1 = vld [vmem:[#allocation2 + $0x70] sm:$0xff] }
 0x177   :  { %1609 = vst [vmem:[#allocation7 + $0x38] sm:$0xff] %v1593_v14  ;;  %v1572_v10 = vadd.f32 %v2483_v35, %v1556_v43  ;;  %v2368_v36 = vadd.f32 %v2159_v4, %v1991_v22  ;;  %v1330_v13 = vpop.f32.mrb[11].mxu0 }
 0x178   :  { %1608 = vst [vmem:[#allocation7 + $0x30] sm:$0xff] %v1592_v11  ;;  %v1571_v49 = vadd.f32 %v2484_v45, %v1555_v3  ;;  %v2369_v51 = vadd.f32 %v1330_v13, %v730_v55  ;;  %v1994_v6 = vpop.f32.mrb[12].mxu1 }
 0x179   :  { %v1595_v58 = vadd.f32 %v3260_v44, %v1572_v10  ;;  %v1558_v18 = vmul.f32 %v2368_v36, %v1542_v16  ;;  %v744_v54 = vpop.f32.mrb[13].mxu1 }
 0x17a   :  { %v1594_v5 = vadd.f32 %v3260_v44, %v1571_v49  ;;  %v1557_v2 = vmul.f32 %v2369_v51, %v1541_v50  ;;  %v2162_v40 = vpop.f32.mrb[12].mxu0 }
 0x17b   :  { %1611 = vst [vmem:[#allocation7 + $0x48] sm:$0xff] %v1595_v58  ;;  %v1574_v23 = vadd.f32 %v2485_v37, %v1558_v18  ;;  %v2370_v29 = vadd.f32 %v2162_v40, %v1994_v6  ;;  %v1342_v25 = vpop.f32.mrb[13].mxu0 }
 0x17c   :  { %1610 = vst [vmem:[#allocation7 + $0x40] sm:$0xff] %v1594_v5  ;;  %v1573_v57 = vadd.f32 %v2486_v30, %v1557_v2  ;;  %v2371_v21 = vadd.f32 %v1342_v25, %v744_v54  ;;  %v1997_v39 = vpop.f32.mrb[14].mxu1 }
 0x17d   :  { %v1597_v20 = vadd.f32 %v3260_v44, %v1574_v23  ;;  %v1560_v28 = vmul.f32 %v2370_v29, %v1544_v19  ;;  %v758_v42 = vpop.f32.mrb[15].mxu1 }
 0x17e   :  { %v1596_v53 = vadd.f32 %v3260_v44, %v1573_v57  ;;  %v1559_v17 = vmul.f32 %v2371_v21, %v1543_v32  ;;  %v2165_v52 = vpop.f32.mrb[14].mxu0 }
 0x17f   :  { %1613 = vst [vmem:[#allocation7 + $0x58] sm:$0xff] %v1597_v20  ;;  %v1576_v46 = vadd.f32 %v2487_v60, %v1560_v28  ;;  %v2372_v26 = vadd.f32 %v2165_v52, %v1997_v39  ;;  %v1354_v34 = vpop.f32.mrb[15].mxu0 }
 0x180   :  { %1612 = vst [vmem:[#allocation7 + $0x50] sm:$0xff] %v1596_v53  ;;  %v1575_v56 = vadd.f32 %v2488_v27, %v1559_v17  ;;  %v2373_v47 = vadd.f32 %v1354_v34, %v758_v42 }
 0x181   :  { %v1599_v63 = vadd.f32 %v3260_v44, %v1576_v46  ;;  %v1562_v7 = vmul.f32 %v2372_v26, %v1546_v9 }
 0x182   :  { %v1598_v24 = vadd.f32 %v3260_v44, %v1575_v56  ;;  %v1561_v41 = vmul.f32 %v2373_v47, %v1545_v33 }
 0x183   :  { %1615 = vst [vmem:[#allocation7 + $0x68] sm:$0xff] %v1599_v63  ;;  %v1578_v38 = vadd.f32 %v1562_v7, %v3485_v15 }
 0x184   :  { %1614 = vst [vmem:[#allocation7 + $0x60] sm:$0xff] %v1598_v24  ;;  %v1577_v8 = vadd.f32 %v2489_v1, %v1561_v41 }
 0x185   :  { %v1601_v31 = vadd.f32 %v3260_v44, %v1578_v38 }
 0x186   :  { %v1600_v14 = vadd.f32 %v3260_v44, %v1577_v8 }
 0x187   :  { %1617 = vst [vmem:[#allocation7 + $0x78] sm:$0xff] %v1601_v31 }
 0x188   :  { %1616 = vst [vmem:[#allocation7 + $0x70] sm:$0xff] %v1600_v14 }
 0x189   :  { %2545 = shalt.err (!%p2542_p6)
}
 0x18a   :  { %s2546_s20 = scalar_lea.hbm %s3299_s4, 2048 }
 0x18b   :  { %p2547_p7 = scmp.ne.s32.totalorder %s3299_s4, %s2546_s20  ;;  %p2550_p8 = scmp.lt.u32.totalorder %s2546_s20, %s3299_s4 }
 0x18d   :  { %p2552_p9 = pnand %p2550_p8, %p2547_p7 }
 0x18f   :  { %2555 = shalt.err (!%p2552_p9)
}
 0x190   :  { %1629 = dma.vmem_to_hbm [thread:$0]  %s1624_s16, 2048, %s3299_s4, [#allocation4], %s2563_s25, %s2563_s25, %s2564_s26  }
 0x191   :  { %2560 = dma.done.wait [#allocation4], 2048  }
 0x192   :  { %2561 = vsyncadd [#allocation4], 4294965248 }
 0x193   :  { %1633 = vsyncpa [#allocation3], 1 }
 0x194   :  { %1634 = vsyncpa [#allocation6], 1 }
 0x195   :  { %1635 = vsyncpa [#allocation4], 1 }

</bundles_post_ra>
